<compile_context>
chip_gen: v7x
topology: tpu7x:2x2x1
jax: 0.10.0
libtpu: 0.0.40
codegen_flags: <defaults>
</compile_context>

<pallas_src>
import jax
import jax.numpy as jnp
import numpy as np
from jax.experimental import pallas as pl
from jax.experimental.pallas import tpu as pltpu


def _attention_kernel(x_ref, w1_ref, b1_ref, wh_ref, bh_ref, out_ref):
    """B images per grid step; natural (B, c, h, w) layout, no relayout of x."""
    f32 = jnp.float32
    x = x_ref[...].astype(f32)                         # (B, c, h, w)
    B, c, h, w = x.shape

    # Adaptive pools (pool_h | pool_w | global) as in-kernel reductions.
    x_h = jnp.mean(x, axis=3)                          # (B, c, h)  lane reduce
    x_w = jnp.mean(x, axis=2)                          # (B, c, w)  sublane reduce
    x_c = jnp.mean(x_h, axis=2, keepdims=True)         # (B, c, 1)  global avg
    pooled = jnp.concatenate([x_h, x_w, x_c], axis=2)  # (B, c, L=h+w+1)

    # Stem: conv1 (1x1) with BN folded in, + ReLU: one batched MXU matmul.
    w1 = w1_ref[...]                                   # (mip, c)
    w1b = jnp.broadcast_to(w1[None], (B,) + w1.shape)  # (B, mip, c)
    y = jnp.einsum("boc,bcl->bol", w1b, pooled, preferred_element_type=f32)
    y = jnp.maximum(y + b1_ref[...][None], 0.0)        # (B, mip, L)

    # Three head 1x1 convs fused: one stacked matmul + one sigmoid pass.
    wh = wh_ref[...]                                   # (3c, mip)
    whb = jnp.broadcast_to(wh[None], (B,) + wh.shape)  # (B, 3c, mip)
    a = jax.nn.sigmoid(
        jnp.einsum("bom,bml->bol", whb, y, preferred_element_type=f32)
        + bh_ref[...][None])                           # (B, 3c, L)

    a_h = a[:, :c, :h]                                 # (B, c, h)
    a_w = a[:, c:2 * c, h:h + w]                       # (B, c, w)
    a_c = a[:, 2 * c:, h + w:]                         # (B, c, 1)

    # Gate product via broadcasting — no expansion matmuls / constants.
    gate = a_h[:, :, :, None] * a_w[:, :, None, :] * a_c[:, :, :, None]
    out_ref[...] = gate.astype(out_ref.dtype)          # (B, c, h, w)


def _pick_batch_block(n, c, h, w, itemsize, max_block_bytes=2 << 20):
    """Largest divisor B of n with grid >= 2 steps (v7x: 2 TCs) and a small block."""
    best = 1
    for b in range(1, n + 1):
        if n % b:
            continue
        if b * c * h * w * itemsize > max_block_bytes:
            continue
        if n >= 2 and n // b < 2:
            continue
        best = b
    return best


def attention_pallas(x, params):
    n, c, h, w = x.shape
    mip = params["w1"].shape[0]
    L = h + w + 1
    itemsize = x.dtype.itemsize

    B = _pick_batch_block(n, c, h, w, itemsize)
    grid = (n // B,)

    consts = (params["w1"], params["b1"], params["w_heads"], params["b_heads"])

    def const_spec(a):
        zeros = (0,) * a.ndim
        return pl.BlockSpec(a.shape, lambda i, z=zeros: z)

    # Right-size the VMEM cap from actual residency (~2x), capped at 48 MiB
    # (v7x has 64 MiB physical VMEM; v5e/v6e have 128 MiB).
    block_bytes = B * c * h * w * itemsize
    const_bytes = sum(int(np.prod(a.shape)) * a.dtype.itemsize for a in consts)
    resident = 2 * 2 * block_bytes + 2 * const_bytes
    vmem_limit = int(min(48 << 20, max(4 << 20, 2 * resident)))

    flops = n * (4 * c * h * w                 # pools + final gate product
                 + 2 * mip * c * L             # stem matmul
                 + 2 * (3 * c) * mip * L)      # fused head matmul
    bytes_accessed = 2 * n * c * h * w * itemsize + const_bytes

    out = pl.pallas_call(
        _attention_kernel,
        out_shape=jax.ShapeDtypeStruct((n, c, h, w), x.dtype),
        grid=grid,
        in_specs=[pl.BlockSpec((B, c, h, w), lambda i: (i, 0, 0, 0))]
                 + [const_spec(a) for a in consts],
        out_specs=pl.BlockSpec((B, c, h, w), lambda i: (i, 0, 0, 0)),
        compiler_params=pltpu.CompilerParams(
            dimension_semantics=("parallel",),
            vmem_limit_bytes=vmem_limit),
        cost_estimate=pl.CostEstimate(
            flops=int(flops),
            transcendentals=int(n * 3 * c * L),    # fused sigmoid pass
            bytes_accessed=int(bytes_accessed)),
    )(x, *consts)
    return out


def attention_reference(x, raw):
    """Pure-JAX reference mirroring the PyTorch forward (eval-mode BN)."""
    eps = 1e-5
    n, c, h, w = x.shape
    x_h = jnp.mean(x, axis=3, keepdims=True)                  # (n,c,h,1)
    x_w = jnp.transpose(jnp.mean(x, axis=2, keepdims=True),
                        (0, 1, 3, 2))                         # (n,c,w,1)
    x_c = jnp.mean(x, axis=(2, 3), keepdims=True)             # (n,c,1,1)
    y = jnp.concatenate([x_h, x_w, x_c], axis=2)              # (n,c,h+w+1,1)

    def conv1x1(t, W, b):  # t: (n,ci,L,1), W: (co,ci), b: (co,)
        return jnp.einsum("ncla,oc->nola", t, W) + b[None, :, None, None]

    y = conv1x1(y, raw["W1"], raw["B1"])
    y = (y - raw["rmean"][None, :, None, None]) / jnp.sqrt(
        raw["rvar"][None, :, None, None] + eps)
    y = y * raw["gamma"][None, :, None, None] + raw["beta"][None, :, None, None]
    y = jnp.maximum(y, 0.0)

    yh, yw, yc = y[:, :, :h], y[:, :, h:h + w], y[:, :, h + w:]
    yw = jnp.transpose(yw, (0, 1, 3, 2))                      # (n,mip,1,w)
    a_h = jax.nn.sigmoid(conv1x1(yh, raw["Wh"], raw["Bh"]))   # (n,c,h,1)
    a_w = jax.nn.sigmoid(conv1x1(yw, raw["Ww"], raw["Bw"]))   # (n,c,1,w)
    a_c = jax.nn.sigmoid(conv1x1(yc, raw["Wc"], raw["Bc"]))   # (n,c,1,1)
    return a_h * a_w * a_c


def make_params(key, channel, reduction=32):
    mip = max(8, channel // reduction)
    ks = jax.random.split(key, 12)
    raw = {
        "W1": jax.random.normal(ks[0], (mip, channel), jnp.float32) * 0.2,
        "B1": jax.random.normal(ks[1], (mip,), jnp.float32) * 0.05,
        "gamma": 1.0 + 0.1 * jax.random.normal(ks[2], (mip,), jnp.float32),
        "beta": 0.05 * jax.random.normal(ks[3], (mip,), jnp.float32),
        "rmean": 0.05 * jax.random.normal(ks[4], (mip,), jnp.float32),
        "rvar": 1.0 + 0.1 * jax.nn.softplus(jax.random.normal(ks[5], (mip,), jnp.float32)),
        "Wh": jax.random.normal(ks[6], (channel, mip), jnp.float32) * 0.2,
        "Bh": jax.random.normal(ks[7], (channel,), jnp.float32) * 0.05,
        "Ww": jax.random.normal(ks[8], (channel, mip), jnp.float32) * 0.2,
        "Bw": jax.random.normal(ks[9], (channel,), jnp.float32) * 0.05,
        "Wc": jax.random.normal(ks[10], (channel, mip), jnp.float32) * 0.2,
        "Bc": jax.random.normal(ks[11], (channel,), jnp.float32) * 0.05,
    }
    eps = 1e-5
    bn_s = raw["gamma"] / jnp.sqrt(raw["rvar"] + eps)
    bn_b = raw["beta"] - raw["rmean"] * bn_s
    kernel_params = {
        # conv1 with eval-mode BatchNorm folded in (exact algebraic fold).
        "w1": raw["W1"] * bn_s[:, None],                           # (mip, c)
        "b1": (raw["B1"] * bn_s + bn_b).reshape(mip, 1),           # (mip, 1)
        # Heads stacked -> one matmul + one sigmoid pass in the kernel.
        "w_heads": jnp.concatenate([raw["Wh"], raw["Ww"], raw["Wc"]], axis=0),   # (3c, mip)
        "b_heads": jnp.concatenate([raw["Bh"], raw["Bw"], raw["Bc"]]).reshape(3 * channel, 1),
    }
    return raw, kernel_params


if __name__ == "__main__":
    key = jax.random.PRNGKey(0)
    kx, kp = jax.random.split(key)

    # n=8 demonstrates batching (B=4 images/step) while keeping grid=2 parallel
    # steps; channel=4, reduction=32 -> mip=8.
    n, c, h, w = 8, 4, 16, 16
    x = jax.random.normal(kx, (n, c, h, w), jnp.float32)
    raw, kernel_params = make_params(kp, c, reduction=32)

    out = jax.block_until_ready(attention_pallas(x, kernel_params))
    ref = jax.block_until_ready(attention_reference(x, raw))

    # Stem/head matmuls run on the MXU inside the kernel while the reference
    # uses XLA einsums, so allow a small matmul-rounding tolerance.
    np.testing.assert_allclose(np.asarray(out), np.asarray(ref),
                               rtol=2e-3, atol=2e-3)
    print("KERNEL_OK")
</pallas_src>

<mosaic_0001>
module attributes {stable_mosaic.version = 11 : i64} {
  func.func @_attention_kernel(%arg0: i32, %arg1: memref<4x4x16x16xf32, #tpu.memory_space<vmem>>, %arg2: memref<8x4xf32, #tpu.memory_space<vmem>>, %arg3: memref<8x1xf32, #tpu.memory_space<vmem>>, %arg4: memref<12x8xf32, #tpu.memory_space<vmem>>, %arg5: memref<12x1xf32, #tpu.memory_space<vmem>>, %arg6: memref<4x4x16x16xf32, #tpu.memory_space<vmem>>) attributes {dimension_semantics = [#tpu.dimension_semantics<parallel>], iteration_bounds = array<i64: 2>, scalar_prefetch = 0 : i64, scratch_operands = 0 : i64, tpu.core_type = #tpu.core_type<tc>, window_params = [{transform_indices = @transform_0, window_bounds = array<i64: 4, 4, 16, 16>}, {pipeline_mode = #tpu.pipeline_mode<synchronous>, transform_indices = @transform_1, window_bounds = array<i64: 8, 4>}, {pipeline_mode = #tpu.pipeline_mode<synchronous>, transform_indices = @transform_2, window_bounds = array<i64: 8, 1>}, {pipeline_mode = #tpu.pipeline_mode<synchronous>, transform_indices = @transform_3, window_bounds = array<i64: 12, 8>}, {pipeline_mode = #tpu.pipeline_mode<synchronous>, transform_indices = @transform_4, window_bounds = array<i64: 12, 1>}, {transform_indices = @transform_5, window_bounds = array<i64: 4, 4, 16, 16>}]} {
    %c0 = arith.constant 0 : index
    %c0_0 = arith.constant 0 : index
    %c0_1 = arith.constant 0 : index
    %c0_2 = arith.constant 0 : index
    %0 = vector.load %arg1[%c0, %c0_0, %c0_1, %c0_2] : memref<4x4x16x16xf32, #tpu.memory_space<vmem>>, vector<4x4x16x16xf32>
    %cst = arith.constant dense<0.000000e+00> : vector<4x4x16xf32>
    %1 = vector.multi_reduction <add>, %0, %cst [3] : vector<4x4x16x16xf32> to vector<4x4x16xf32>
    %cst_3 = arith.constant 1.600000e+01 : f32
    %2 = vector.broadcast %cst_3 : f32 to vector<4x4x16xf32>
    %3 = arith.divf %1, %2 : vector<4x4x16xf32>
    %cst_4 = arith.constant dense<0.000000e+00> : vector<4x4x16xf32>
    %4 = vector.multi_reduction <add>, %0, %cst_4 [2] : vector<4x4x16x16xf32> to vector<4x4x16xf32>
    %cst_5 = arith.constant 1.600000e+01 : f32
    %5 = vector.broadcast %cst_5 : f32 to vector<4x4x16xf32>
    %6 = arith.divf %4, %5 : vector<4x4x16xf32>
    %cst_6 = arith.constant dense<0.000000e+00> : vector<4x4xf32>
    %7 = vector.multi_reduction <add>, %3, %cst_6 [2] : vector<4x4x16xf32> to vector<4x4xf32>
    %8 = vector.shape_cast %7 : vector<4x4xf32> to vector<4x4x1xf32>
    %cst_7 = arith.constant 1.600000e+01 : f32
    %9 = vector.broadcast %cst_7 : f32 to vector<4x4x1xf32>
    %10 = arith.divf %8, %9 : vector<4x4x1xf32>
    %11 = tpu.concatenate %3, %6, %10 in 2 : vector<4x4x16xf32>, vector<4x4x16xf32>, vector<4x4x1xf32> -> vector<4x4x33xf32>
    %c0_8 = arith.constant 0 : index
    %c0_9 = arith.constant 0 : index
    %12 = vector.load %arg2[%c0_8, %c0_9] : memref<8x4xf32, #tpu.memory_space<vmem>>, vector<8x4xf32>
    %13 = vector.shape_cast %12 : vector<8x4xf32> to vector<1x8x4xf32>
    %14 = vector.shape_cast %13 : vector<1x8x4xf32> to vector<1x8x4xf32>
    %15 = vector.broadcast %14 : vector<1x8x4xf32> to vector<4x8x4xf32>
    "tpu.trace_start"() <{level = 10 : i32, message = "boc,bcl->bol"}> : () -> ()
    %cst_10 = arith.constant dense<0.000000e+00> : vector<4x8x33xf32>
    %16 = tpu.matmul %15, %11, %cst_10 {dimension_numbers = #tpu.dot_dimension_numbers<[2], [1], [1], [2], [0, 0, 0, 1, 1, 2], [0], [0]>} : vector<4x8x4xf32>, vector<4x4x33xf32>, vector<4x8x33xf32> -> vector<4x8x33xf32>
    "tpu.trace_stop"() : () -> ()
    %c0_11 = arith.constant 0 : index
    %c0_12 = arith.constant 0 : index
    %17 = vector.load %arg3[%c0_11, %c0_12] : memref<8x1xf32, #tpu.memory_space<vmem>>, vector<8x1xf32>
    %18 = vector.shape_cast %17 : vector<8x1xf32> to vector<1x8x1xf32>
    %19 = vector.broadcast %18 : vector<1x8x1xf32> to vector<4x8x33xf32>
    %20 = arith.addf %16, %19 : vector<4x8x33xf32>
    %cst_13 = arith.constant 0.000000e+00 : f32
    %21 = vector.broadcast %cst_13 : f32 to vector<4x8x33xf32>
    %22 = arith.maximumf %20, %21 : vector<4x8x33xf32>
    %c0_14 = arith.constant 0 : index
    %c0_15 = arith.constant 0 : index
    %23 = vector.load %arg4[%c0_14, %c0_15] : memref<12x8xf32, #tpu.memory_space<vmem>>, vector<12x8xf32>
    %24 = vector.shape_cast %23 : vector<12x8xf32> to vector<1x12x8xf32>
    %25 = vector.shape_cast %24 : vector<1x12x8xf32> to vector<1x12x8xf32>
    %26 = vector.broadcast %25 : vector<1x12x8xf32> to vector<4x12x8xf32>
    "tpu.trace_start"() <{level = 10 : i32, message = "bom,bml->bol"}> : () -> ()
    %cst_16 = arith.constant dense<0.000000e+00> : vector<4x12x33xf32>
    %27 = tpu.matmul %26, %22, %cst_16 {dimension_numbers = #tpu.dot_dimension_numbers<[2], [1], [1], [2], [0, 0, 0, 1, 1, 2], [0], [0]>} : vector<4x12x8xf32>, vector<4x8x33xf32>, vector<4x12x33xf32> -> vector<4x12x33xf32>
    "tpu.trace_stop"() : () -> ()
    %c0_17 = arith.constant 0 : index
    %c0_18 = arith.constant 0 : index
    %28 = vector.load %arg5[%c0_17, %c0_18] : memref<12x1xf32, #tpu.memory_space<vmem>>, vector<12x1xf32>
    %29 = vector.shape_cast %28 : vector<12x1xf32> to vector<1x12x1xf32>
    %30 = vector.broadcast %29 : vector<1x12x1xf32> to vector<4x12x33xf32>
    %31 = arith.addf %27, %30 : vector<4x12x33xf32>
    %32 = arith.negf %31 : vector<4x12x33xf32>
    %33 = math.exp %32 : vector<4x12x33xf32>
    %cst_19 = arith.constant 1.000000e+00 : f32
    %34 = vector.broadcast %cst_19 : f32 to vector<4x12x33xf32>
    %35 = arith.addf %34, %33 : vector<4x12x33xf32>
    %36 = arith.divf %34, %35 : vector<4x12x33xf32>
    %37 = vector.extract_strided_slice %36 {offsets = [0, 0, 0], sizes = [4, 4, 16], strides = [1, 1, 1]} : vector<4x12x33xf32> to vector<4x4x16xf32>
    %38 = vector.extract_strided_slice %36 {offsets = [0, 4, 16], sizes = [4, 4, 16], strides = [1, 1, 1]} : vector<4x12x33xf32> to vector<4x4x16xf32>
    %39 = vector.extract_strided_slice %36 {offsets = [0, 8, 32], sizes = [4, 4, 1], strides = [1, 1, 1]} : vector<4x12x33xf32> to vector<4x4x1xf32>
    %40 = vector.shape_cast %37 : vector<4x4x16xf32> to vector<4x4x16x1xf32>
    %41 = vector.shape_cast %38 : vector<4x4x16xf32> to vector<4x4x1x16xf32>
    %42 = vector.broadcast %40 : vector<4x4x16x1xf32> to vector<4x4x16x16xf32>
    %43 = vector.broadcast %41 : vector<4x4x1x16xf32> to vector<4x4x16x16xf32>
    %44 = arith.mulf %42, %43 : vector<4x4x16x16xf32>
    %45 = vector.shape_cast %39 : vector<4x4x1xf32> to vector<4x4x1x1xf32>
    %46 = vector.broadcast %45 : vector<4x4x1x1xf32> to vector<4x4x16x16xf32>
    %47 = arith.mulf %44, %46 : vector<4x4x16x16xf32>
    %c0_20 = arith.constant 0 : index
    %c0_21 = arith.constant 0 : index
    %c0_22 = arith.constant 0 : index
    %c0_23 = arith.constant 0 : index
    %48 = vector.load %arg6[%c0_20, %c0_21, %c0_22, %c0_23] : memref<4x4x16x16xf32, #tpu.memory_space<vmem>>, vector<4x4x16x16xf32>
    tpu.vector_store %arg6[%c0_20, %c0_21, %c0_22, %c0_23], %47 {strides = array<i32>} : memref<4x4x16x16xf32, #tpu.memory_space<vmem>>, vector<4x4x16x16xf32>,
    return
  }
  func.func @transform_0(%arg0: i32) -> (i32, i32, i32, i32) {
    %c0_i32 = arith.constant 0 : i32
    %c0_i32_0 = arith.constant 0 : i32
    %c0_i32_1 = arith.constant 0 : i32
    %c0_i32_2 = arith.constant 0 : i32
    return %arg0, %c0_i32, %c0_i32_0, %c0_i32_1 : i32, i32, i32, i32
  }
  func.func @transform_1(%arg0: i32) -> (i32, i32) {
    %c0_i32 = arith.constant 0 : i32
    %c0_i32_0 = arith.constant 0 : i32
    %c0_i32_1 = arith.constant 0 : i32
    return %c0_i32, %c0_i32_0 : i32, i32
  }
  func.func @transform_2(%arg0: i32) -> (i32, i32) {
    %c0_i32 = arith.constant 0 : i32
    %c0_i32_0 = arith.constant 0 : i32
    %c0_i32_1 = arith.constant 0 : i32
    return %c0_i32, %c0_i32_0 : i32, i32
  }
  func.func @transform_3(%arg0: i32) -> (i32, i32) {
    %c0_i32 = arith.constant 0 : i32
    %c0_i32_0 = arith.constant 0 : i32
    %c0_i32_1 = arith.constant 0 : i32
    return %c0_i32, %c0_i32_0 : i32, i32
  }
  func.func @transform_4(%arg0: i32) -> (i32, i32) {
    %c0_i32 = arith.constant 0 : i32
    %c0_i32_0 = arith.constant 0 : i32
    %c0_i32_1 = arith.constant 0 : i32
    return %c0_i32, %c0_i32_0 : i32, i32
  }
  func.func @transform_5(%arg0: i32) -> (i32, i32, i32, i32) {
    %c0_i32 = arith.constant 0 : i32
    %c0_i32_0 = arith.constant 0 : i32
    %c0_i32_1 = arith.constant 0 : i32
    %c0_i32_2 = arith.constant 0 : i32
    return %arg0, %c0_i32, %c0_i32_0, %c0_i32_1 : i32, i32, i32, i32
  }
}

</mosaic_0001>

<bundles_post_ra>
// kernel: tpu_custom_call.1
= control target key start
LH: loop header
LB: loop body
LE: loop exit
PB: predicated region body
PF: predicated region fallthrough
CT: control target
= control target key end

     0   :  { %10 = vsyncpa [#allocation3], 0  ;;  %s3506_s0 = inlined_call_operand.hbm [shape: f32[8,4,16,16], index: 0, kind: input, shape index: {}]   ;;  %s3507_s1 = inlined_call_operand.vmem [shape: f32[8,4], index: 1, kind: input, shape index: {}]   ;;  %s3508_s2 = inlined_call_operand.vmem [shape: f32[8,1], index: 2, kind: input, shape index: {}]   ;;  %s3509_s3 = inlined_call_operand.vmem [shape: f32[12,8], index: 3, kind: input, shape index: {}]   ;;  %s3510_s4 = inlined_call_operand.vmem [shape: f32[12,1], index: 4, kind: input, shape index: {}]   ;;  %s3511_s5 = inlined_call_operand.hbm [shape: f32[8,4,16,16], index: 5, kind: output, shape index: {}]  }
   0x1   :  { %12 = vsyncpa [#allocation3 + $0x1], 0 }
   0x2   :  { %13 = vsyncpa [#allocation4], 0 }
   0x3   :  { %15 = vsyncpa [#allocation4 + $0x1], 0  ;;  %s2716_s18 = smov 0   ;;  %s2718_s19 = smov 0  }
   0x4   :  { %s2720_s20 = smov 0   ;;  %s2722_s21 = smov 0  }
   0x5 LB: > { %s2737_s22 = sadd.s32 4294967295, %s2671_s21   ;;  %s2378_s23 = sadd.s32 4294967294, %s2671_s21   ;;  %s2671_s21 = sphi %s2722_s21, %s3524_s21   ;;  %s2667_s20 = sphi %s2720_s20, %s3523_s20   ;;  %s2663_s19 = sphi %s2718_s19, %s3522_s19   ;;  %s2659_s18 = sphi %s2716_s18, %s3521_s18  }
   0x6   : > { %s2741_s24 = sadd.s32 1, %s2671_s21   ;;  %s28_s25 = sadd.s32 1, %s2667_s20 }
   0x7   : > { %s25_s26 = ssub.s32 %s2671_s21, %s2741_s24  ;;  %p35_p0 = scmp.ne.s32.totalorder %s2667_s20, %s2663_s19 }
   0x8   : > { %p26_p1 = scmp.eq.s32.totalorder %s25_s26, 0  ;;  %p36_p2 = scmp.eq.s32.totalorder %s2671_s21, 0 }
   0x9   : > { %p41_p3 = scmp.ne.s32.totalorder %s2663_s19, %s2659_s18  ;;  %p42_p4 = scmp.eq.s32.totalorder %s2737_s22, 0 }
   0xa   : > { %s2753_s27 = scalar_select %p26_p1, %s2667_s20, %s28_s25  }
   0xb   : > { %p2755_p5 = por %p36_p2, %p35_p0  ;;  %p2759_p6 = por %p42_p4, %p41_p3 }
   0xc   : > { %p149_p7 = scmp.eq.s32.totalorder %s2737_s22, 1  ;;  %p155_p8 = scmp.eq.s32.totalorder %s2378_s23, 1 }
   0xd   : > { %p2494_p10 = scmp.lt.s32.totalorder %s2671_s21, 2  ;;  %s187_s7 = sand.u32 1, %s2667_s20  }
   0xe   : > { %p2766_p11 = por %p149_p7, %p35_p0  ;;  %p2770_p12 = por %p155_p8, %p41_p3 }
   0xf   : > { %s2419_s8 = sshll.u32 %s2671_s21, 12  ;;  %s2381_s9 = sshll.u32 %s187_s7, 8 }
  0x10   : > { %s3515_s30 = scalar_select %p2766_p11, 1, 0 }
  0x11   : > { %s3516_s6 = scalar_select %p2770_p12, 1, 0 }
  0x12   : > { %s2779_s12 = scalar_lea.hbm %s3506_s0, %s2419_s8  ;;  %s191_s13 = scalar_lea.vmem [#allocation2], %s2381_s9 }
  0x13   : > { %s199_s14 = sshll.u32 %s191_s13, 4  ;;  %p2783_p13 = pnand %p2494_p10, %p2755_p5  ;;  %s2787_s14 = int_to_ptr.vmem [resolvable:$true] %s199_s14 }
  0x14   : > { %s2789_s16 = scalar_lea.sflag [#allocation3], %s187_s7  ;;  %s2575_s17 = scalar_lea.hbm %s2779_s12, 4096 }
  0x15   : > { %p2576_p0 = scmp.ne.s32.totalorder %s2779_s12, %s2575_s17  ;;  %p2577_p1 = pneg %p2783_p13 }
  0x16   : > { %s2580_s26 = scalar_lea.hbm %s3506_s0, 8192  ;;  %p2581_p4 = scmp.lt.u32.totalorder %s2779_s12, %s3506_s0 }
  0x17   : > { %p2578_p2 = pnand %p2577_p1, %p2576_p0  ;;  %p2582_p5 = scmp.lt.u32.totalorder %s2580_s26, %s2575_s17 }
  0x18   : > { %p2584_p8 = scmp.lt.u32.totalorder %s2575_s17, %s2779_s12 }
  0x19   : > { %p2579_p3 = pneg %p2578_p2  ;;  %p2583_p7 = por %p2582_p5, %p2581_p4 }
  0x1b   : > { %p2585_p10 = por %p2584_p8, %p2583_p7 }
  0x1d   : > { %p2586_p9 = pnand %p2585_p10, %p2579_p3 }
  0x1f   : > { %2589 = shalt.err (!%p2586_p9)
}
  0x20   : > { %s2590_s7 = scalar_lea.vmem %s2787_s14, 4096  ;;  %s2673_s9 = smov [#allocation2]  }
  0x21   : > { %p2591_p0 = scmp.ne.s32.totalorder %s2787_s14, %s2590_s7  ;;  %s2595_s10 = sshll.u32 %s2673_s9, 4  ;;  %s2596_s10 = int_to_ptr.vmem [resolvable:$false] %s2595_s10 }
  0x22   : > { %s2597_s11 = scalar_lea.vmem %s2596_s10, 8192  ;;  %p2598_p11 = scmp.lt.s32.totalorder %s2787_s14, %s2596_s10 }
  0x23   : > { %p2593_p2 = pnand %p2591_p0, %p2577_p1  ;;  %p2599_p4 = scmp.lt.s32.totalorder %s2597_s11, %s2590_s7 }
  0x25   : > { %p2594_p12 = pneg %p2593_p2  ;;  %p2600_p5 = por %p2599_p4, %p2598_p11 }
  0x27   : > { %p2601_p7 = pnand %p2600_p5, %p2594_p12 }
  0x29   : > { %2604 = shalt.err (!%p2601_p7)
}
  0x2a   : > { %s2674_s13 = smov 128   ;;  %s2675_s17 = smov 8  }
  0x2b   : > { %2489 = dma.hbm_to_vmem [thread:$0]  (!%p2783_p13), %s2779_s12, 4096, %s2787_s14, %s2789_s16, %s2674_s13, %s2674_s13, %s2675_s17  }
  0x2c   : > { %p2385_p9 = scmp.ge.s32.totalorder %s2671_s21, 1  ;;  %p207_p1 = scmp.lt.s32.totalorder %s2671_s21, 3 }
  0x2e   : > { %p208_p3 = pnand %p2385_p9, %p207_p1 }
  0x2f   : > { %s2820_s23 = sand.u32 (!%p208_p3), 1, %s2663_s19  }
  0x30   : > { %211 = sbr.rel (%p208_p3) target bundleno = 1253 (0x4e5), region = 40  ;;  %s2386_s25 = sshll.u32 (!%p208_p3), %s2820_s23, 8 }
  0x31   : > { %s214_s26 = scalar_lea.sflag (!%p208_p3), [#allocation3], %s2820_s23  ;;  %s2826_s28 = scalar_lea.vmem (!%p208_p3), [#allocation2], %s2386_s25 }
  0x37   : > { %2650 = dma.done.wait (%p2759_p6), %s214_s26, 4096  }
  0x38   : > { %2652 = vsyncadd (%p2759_p6), %s214_s26, 4294963200  ;;  %vm278_vm0 = vcmask 130048   ;;  %v248_v0 = vld [vmem:[%s2826_s28 + $0x10] sm:$0xff]  ;;  %v246_v1 = vld [vmem:[%s2826_s28] sm:$0xff]  ;;  %vm716_vm1 = vcmask 1041409   ;;  %vm718_vm2 = vcmask 1042434  }
  0x39   : > { %v249_v2 = vld [vmem:[%s2826_s28 + $0x18] sm:$0xff]  ;;  %v285_v3 = vsel %vm278_vm0, %v248_v0, 0.0  ;;  %v279_v4 = vsel %vm278_vm0, %v246_v1, 0.0  ;;  %v247_v6 = vld [vmem:[%s2826_s28 + $0x8] sm:$0xff]  ;;  %v254_v8 = vld [vmem:[%s2826_s28 + $0x40] sm:$0xff]  ;;  %vm720_vm3 = vcmask 1043459  }
  0x3a   : > { %v288_v5 = vsel %vm278_vm0, %v249_v2, 0.0  ;;  %v255_v7 = vld [vmem:[%s2826_s28 + $0x48] sm:$0xff]  ;;  %286 = vadd.xlane.f32.xlu1 %v285_v3  ;;  %280 = vadd.xlane.f32.xlu0 %v279_v4  ;;  %v282_v10 = vsel %vm278_vm0, %v247_v6, 0.0  ;;  %v303_v12 = vsel %vm278_vm0, %v254_v8, 0.0  ;;  %v257_v13 = vld [vmem:[%s2826_s28 + $0x58] sm:$0xff]  ;;  %v256_v14 = vld [vmem:[%s2826_s28 + $0x50] sm:$0xff] }
  0x3b   : > { %v2841_v9 = vadd.f32 %v288_v5, %v285_v3  ;;  %v306_v11 = vsel %vm278_vm0, %v255_v7, 0.0  ;;  %v251_v15 = vld [vmem:[%s2826_s28 + $0x28] sm:$0xff]  ;;  %v2849_v16 = vadd.f32 %v282_v10, %v279_v4  ;;  %v312_v18 = vsel %vm278_vm0, %v257_v13, 0.0  ;;  %v250_v20 = vld [vmem:[%s2826_s28 + $0x20] sm:$0xff]  ;;  %v253_v29 = vld [vmem:[%s2826_s28 + $0x38] sm:$0xff]  ;;  %s2676_s29 = smov 16  }
  0x3c   : > { %v2851_v17 = vadd.f32 %v306_v11, %v303_v12  ;;  %v309_v19 = vsel %vm278_vm0, %v256_v14, 0.0  ;;  %v259_v21 = vld [vmem:[%s2826_s28 + $0x68] sm:$0xff]  ;;  %v258_v22 = vld [vmem:[%s2826_s28 + $0x60] sm:$0xff]  ;;  %v294_v24 = vsel %vm278_vm0, %v251_v15, 0.0  ;;  %v291_v25 = vsel %vm278_vm0, %v250_v20, 0.0  ;;  %v252_v30 = vld [vmem:[%s2826_s28 + $0x30] sm:$0xff] }
  0x3d   : > { %v2858_v23 = vadd.f32 %v312_v18, %v309_v19  ;;  %v2862_v26 = vadd.f32 %v294_v24, %v291_v25  ;;  %v318_v27 = vsel %vm278_vm0, %v259_v21, 0.0  ;;  %v315_v28 = vsel %vm278_vm0, %v258_v22, 0.0  ;;  %v261_v32 = vld [vmem:[%s2826_s28 + $0x78] sm:$0xff]  ;;  %v260_v33 = vld [vmem:[%s2826_s28 + $0x70] sm:$0xff]  ;;  %v263_v40 = vld [vmem:[%s2826_s28 + $0x88] sm:$0xff]  ;;  %p3518_p11 = scmp.ne.s32.totalorder %s3515_s30, 0 }
  0x3e   : > { %289 = vadd.xlane.f32.xlu1 %v288_v5  ;;  %283 = vadd.xlane.f32.xlu0 %v282_v10  ;;  %v2868_v31 = vadd.f32 %v318_v27, %v315_v28  ;;  %v300_v34 = vsel %vm278_vm0, %v253_v29, 0.0  ;;  %v297_v35 = vsel %vm278_vm0, %v252_v30, 0.0  ;;  %v324_v37 = vsel %vm278_vm0, %v261_v32, 0.0  ;;  %v262_v41 = vld [vmem:[%s2826_s28 + $0x80] sm:$0xff]  ;;  %v265_v42 = vld [vmem:[%s2826_s28 + $0x98] sm:$0xff]  ;;  %v264_v43 = vld [vmem:[%s2826_s28 + $0x90] sm:$0xff] }
  0x3f   : > { %v2874_v36 = vadd.f32 %v300_v34, %v297_v35  ;;  %v321_v38 = vsel %vm278_vm0, %v260_v33, 0.0  ;;  %v271_v44 = vld [vmem:[%s2826_s28 + $0xc8] sm:$0xff]  ;;  %v270_v45 = vld [vmem:[%s2826_s28 + $0xc0] sm:$0xff]  ;;  %v330_v46 = vsel %vm278_vm0, %v263_v40, 0.0  ;;  %v327_v47 = vsel %vm278_vm0, %v262_v41, 0.0  ;;  %v273_v48 = vld [vmem:[%s2826_s28 + $0xd8] sm:$0xff] }
  0x40   : > { %v2878_v39 = vadd.f32 %v324_v37, %v321_v38  ;;  %v464_v49 = vadd.f32 %v330_v46, %v327_v47  ;;  %v336_v50 = vsel %vm278_vm0, %v265_v42, 0.0  ;;  %v333_v51 = vsel %vm278_vm0, %v264_v43, 0.0  ;;  %v272_v52 = vld [vmem:[%s2826_s28 + $0xd0] sm:$0xff]  ;;  %v267_v53 = vld [vmem:[%s2826_s28 + $0xa8] sm:$0xff]  ;;  %v266_v54 = vld [vmem:[%s2826_s28 + $0xa0] sm:$0xff]  ;;  %s2683_s7 = smov [#allocation5]  }
  0x41   : > { %v471_v55 = vadd.f32 %v336_v50, %v333_v51  ;;  %v354_v56 = vsel %vm278_vm0, %v271_v44, 0.0  ;;  %v351_v57 = vsel %vm278_vm0, %v270_v45, 0.0  ;;  %v360_v59 = vsel %vm278_vm0, %v273_v48, 0.0  ;;  %v275_v63 = vld [vmem:[%s2826_s28 + $0xe8] sm:$0xff]  ;;  %v274_v0 = vld [vmem:[%s2826_s28 + $0xe0] sm:$0xff]  ;;  %v269_v3 = vld [vmem:[%s2826_s28 + $0xb8] sm:$0xff] }
  0x42   : > { %307 = vadd.xlane.f32.xlu1 %v306_v11  ;;  %304 = vadd.xlane.f32.xlu0 %v303_v12  ;;  %v2896_v58 = vadd.f32 %v354_v56, %v351_v57  ;;  %v357_v60 = vsel %vm278_vm0, %v272_v52, 0.0  ;;  %v342_v61 = vsel %vm278_vm0, %v267_v53, 0.0  ;;  %v339_v62 = vsel %vm278_vm0, %v266_v54, 0.0  ;;  %v268_v4 = vld [vmem:[%s2826_s28 + $0xb0] sm:$0xff]  ;;  %v277_v8 = vld [vmem:[%s2826_s28 + $0xf8] sm:$0xff]  ;;  %s2609_s9 = sshll.u32 %s2683_s7, 4  ;;  %s2610_s9 = int_to_ptr.vmem [resolvable:$false] %s2609_s9 }
  0x43   : > { %v2904_v1 = vadd.f32 %v360_v59, %v357_v60  ;;  %v478_v2 = vadd.f32 %v342_v61, %v339_v62  ;;  %v366_v5 = vsel %vm278_vm0, %v275_v63, 0.0  ;;  %v363_v6 = vsel %vm278_vm0, %v274_v0, 0.0  ;;  %v276_v10 = vld [vmem:[%s2826_s28 + $0xf0] sm:$0xff]  ;;  %s2682_s28 = smov 112   ;;  %s2611_s10 = scalar_lea.vmem %s2610_s9, 8192 }
  0x44   : > { %v2910_v7 = vadd.f32 %v366_v5, %v363_v6  ;;  %v348_v11 = vsel %vm278_vm0, %v269_v3, 0.0  ;;  %v345_v12 = vsel %vm278_vm0, %v268_v4, 0.0  ;;  %v2917_v14 = vsel %vm278_vm0, %v277_v8, 0.0 }
  0x45   : > { %v485_v13 = vadd.f32 %v348_v11, %v345_v12  ;;  %v2920_v15 = vsel %vm278_vm0, %v276_v10, 0.0  ;;  %v444_v20 = vrot.slane %v2858_v23, 4  ;;  %v451_v21 = vrot.slane %v2868_v31, 4 }
  0x46   : > { %313 = vadd.xlane.f32.xlu1 %v312_v18  ;;  %310 = vadd.xlane.f32.xlu0 %v309_v19  ;;  %v2924_v18 = vadd.f32 %v2917_v14, %v2920_v15  ;;  %v437_v19 = vrot.slane %v2851_v17, 4  ;;  %v465_v22 = vrot.slane %v464_v49, 4  ;;  %v479_v29 = vrot.slane %v478_v2, 4 }
  0x47   : > { %v458_v30 = vrot.slane %v2878_v39, 4  ;;  %v486_v40 = vrot.slane %v485_v13, 4  ;;  %vm579_vm4 = vcmask 130112   ;;  %vm735_vm5 = vcmask 125952  }
  0x48   : > { %v466_v32 = vadd.f32 %v465_v22, %v464_v49  ;;  %vm2678_vm6 = vmmov 0   ;;  %vm796_vm7 = vcmask 261120   ;;  %vm812_vm8 = vcmask 1043456  }
  0x49   : > { %vm808_vm9 = vcmask 31744   ;;  %vm1123_vm10 = vcmask 64512  }
  0x4a   : > { %295 = vadd.xlane.f32.xlu1 %v294_v24  ;;  %292 = vadd.xlane.f32.xlu0 %v291_v25  ;;  %v438_v24 = vadd.f32 %v437_v19, %v2851_v17  ;;  %v445_v25 = vadd.f32 %v444_v20, %v2858_v23  ;;  %v459_v17 = vadd.f32 %v458_v30, %v2878_v39  ;;  %v467_v23 = vrot.slane %v466_v32, 2 }
  0x4b   : > { %v493_v30 = vrot.slane %v2896_v58, 4 }
  0x4c   : > { %v439_v33 = vrot.slane %v438_v24, 2  ;;  %v460_v45 = vrot.slane %v459_v17, 2 }
  0x4e   : > { %319 = vadd.xlane.f32.xlu1 %v318_v27  ;;  %316 = vadd.xlane.f32.xlu0 %v315_v28  ;;  %v472_v27 = vrot.slane %v471_v55, 4  ;;  %v452_v28 = vadd.f32 %v451_v21, %v2868_v31  ;;  %v440_v41 = vadd.f32 %v439_v33, %v438_v24  ;;  %v461_v39 = vadd.f32 %v460_v45, %v459_v17 }
  0x4f   : > { %v507_v33 = vrot.slane %v2910_v7, 4  ;;  %v514_v45 = vrot.slane %v2924_v18, 4 }
  0x50   : > { %v441_v48 = vrot.slane %v440_v41, 1 }
  0x52   : > { %301 = vadd.xlane.f32.xlu1 %v300_v34  ;;  %298 = vadd.xlane.f32.xlu0 %v297_v35  ;;  %v446_v34 = vrot.slane %v445_v25, 2  ;;  %v473_v35 = vadd.f32 %v472_v27, %v471_v55  ;;  %v442_v55 = vadd.f32 %v441_v48, %v440_v41  ;;  %v416_v27 = vrot.slane %v2841_v9, 4 }
  0x54   : > { %v447_v42 = vadd.f32 %v446_v34, %v445_v25  ;;  %v474_v31 = vrot.slane %v473_v35, 2  ;;  %v524_v0 = vmul.f32 0.0625, %v442_v55  ;;  %v417_v34 = vadd.f32 %v416_v27, %v2841_v9 }
  0x56   : > { %325 = vadd.xlane.f32.xlu1 %v324_v37  ;;  %322 = vadd.xlane.f32.xlu0 %v321_v38  ;;  %v453_v37 = vrot.slane %v452_v28, 2  ;;  %v480_v38 = vadd.f32 %v479_v29, %v478_v2  ;;  %v448_v49 = vrot.slane %v447_v42, 1  ;;  %v423_v29 = vrot.slane %v2862_v26, 4 }
  0x57   : > { %v418_v41 = vrot.slane %v417_v34, 2 }
  0x58   : > { %v454_v43 = vadd.f32 %v453_v37, %v452_v28  ;;  %v481_v44 = vrot.slane %v480_v38, 2  ;;  %v409_v28 = vrot.slane %v2849_v16, 4  ;;  %v424_v37 = vadd.f32 %v423_v29, %v2862_v26 }
  0x5a   : > { %331 = vadd.xlane.f32.xlu1 %v330_v46  ;;  %328 = vadd.xlane.f32.xlu0 %v327_v47  ;;  %v487_v46 = vadd.f32 %v486_v40, %v485_v13  ;;  %v468_v47 = vadd.f32 %v467_v23, %v466_v32  ;;  %v482_v52 = vadd.f32 %v481_v44, %v480_v38  ;;  %v500_v32 = vrot.slane %v2904_v1, 4 }
  0x5b   : > { %v494_v38 = vadd.f32 %v493_v30, %v2896_v58  ;;  %v430_v40 = vrot.slane %v2874_v36, 4  ;;  %v508_v23 = vadd.f32 %v507_v33, %v2910_v7 }
  0x5c   : > { %v488_v53 = vrot.slane %v487_v46, 2  ;;  %v469_v54 = vrot.slane %v468_v47, 1  ;;  %v501_v17 = vadd.f32 %v500_v32, %v2904_v1  ;;  %v515_v1 = vadd.f32 %v514_v45, %v2924_v18 }
  0x5d   : > { %v431_v9 = vadd.f32 %v430_v40, %v2874_v36  ;;  %v568_v32 = vlaneseq }
  0x5e   : > { %337 = vadd.xlane.f32.xlu1 %v336_v50  ;;  %334 = vadd.xlane.f32.xlu0 %v333_v51  ;;  %v475_v50 = vadd.f32 %v474_v31, %v473_v35  ;;  %v455_v51 = vrot.slane %v454_v43, 1  ;;  %v470_v63 = vadd.f32 %v469_v54, %v468_v47  ;;  %v410_v35 = vadd.f32 %v409_v28, %v2849_v16 }
  0x5f   : > { %v425_v31 = vrot.slane %v424_v37, 2  ;;  %v502_v44 = vrot.slane %v501_v17, 2  ;;  %v509_v16 = vrot.slane %v508_v23, 2  ;;  %v516_v54 = vrot.slane %v515_v1, 2 }
  0x60   : > { %v528_v10 = vmul.f32 0.0625, %v470_v63  ;;  %v2972_v40 = vshrl.u32 %v568_v32, 7 }
  0x61   : > { %v426_v47 = vadd.f32 %v425_v31, %v424_v37  ;;  %v503_v48 = vadd.f32 %v502_v44, %v501_v17 }
  0x62   : > { %355 = vadd.xlane.f32.xlu1 %v354_v56  ;;  %352 = vadd.xlane.f32.xlu0 %v351_v57  ;;  %v449_v56 = vadd.f32 %v448_v49, %v447_v42  ;;  %v476_v57 = vrot.slane %v475_v50, 1  ;;  %v411_v42 = vrot.slane %v410_v35, 2  ;;  %v432_v49 = vrot.slane %v431_v9, 2 }
  0x64   : > { %v525_v2 = vmul.f32 0.0625, %v449_v56  ;;  %v477_v3 = vadd.f32 %v476_v57, %v475_v50  ;;  %v412_v26 = vadd.f32 %v411_v42, %v410_v35  ;;  %v510_v50 = vadd.f32 %v509_v16, %v508_v23 }
  0x65   : > { %v433_v55 = vadd.f32 %v432_v49, %v431_v9  ;;  %v569_v35 = vand.u32 127, %v568_v32 }
  0x66   : > { %361 = vadd.xlane.f32.xlu1 %v360_v59  ;;  %358 = vadd.xlane.f32.xlu0 %v357_v60  ;;  %v456_v59 = vadd.f32 %v455_v51, %v454_v43  ;;  %v483_v60 = vrot.slane %v482_v52, 1  ;;  %v529_v13 = vmul.f32 0.0625, %v477_v3  ;;  %v495_v43 = vrot.slane %v494_v38, 2 }
  0x67   : > { %v413_v51 = vrot.slane %v412_v26, 1  ;;  %v511_v56 = vrot.slane %v510_v50, 1  ;;  %v434_v63 = vrot.slane %v433_v55, 1  ;;  %v574_v17 = vadd.s32 4294967288, %v569_v35 }
  0x68   : > { %v526_v4 = vmul.f32 0.0625, %v456_v59  ;;  %v484_v8 = vadd.f32 %v483_v60, %v482_v52  ;;  %v496_v58 = vadd.f32 %v495_v43, %v494_v38  ;;  %v427_v52 = vrot.slane %v426_v47, 1 }
  0x69   : > { %v414_v36 = vadd.f32 %v413_v51, %v412_v26  ;;  %v2975_v42 = vsub.s32 %v574_v17, %v2972_v40  ;;  %v2978_v9 = vsub.s32 %v569_v35, %v2972_v40 }
  0x6a   : > { %343 = vadd.xlane.f32.xlu1 %v342_v61  ;;  %340 = vadd.xlane.f32.xlu0 %v339_v62  ;;  %v462_v61 = vrot.slane %v461_v39, 1  ;;  %v489_v62 = vadd.f32 %v488_v53, %v487_v46  ;;  %v530_v19 = vmul.f32 0.0625, %v484_v8  ;;  %v419_v46 = vadd.f32 %v418_v41, %v417_v34 }
  0x6b   : > { %v504_v53 = vrot.slane %v503_v48, 1  ;;  %v428_v59 = vadd.f32 %v427_v52, %v426_v47  ;;  %v520_v18 = vmul.f32 0.0625, %v414_v36 }
  0x6c   : > { %v420_v7 = vrot.slane %v419_v46, 1 }
  0x6d   : > { %v522_v3 = vmul.f32 0.0625, %v428_v59 }
  0x6e   : > { %367 = vadd.xlane.f32.xlu1 %v366_v5  ;;  %364 = vadd.xlane.f32.xlu0 %v363_v6  ;;  %v490_v5 = vrot.slane %v489_v62, 1  ;;  %v463_v6 = vadd.f32 %v462_v61, %v461_v39  ;;  %v497_v39 = vrot.slane %v496_v58, 1  ;;  %v421_v57 = vadd.f32 %v420_v7, %v419_v46 }
  0x6f   : > { %v505_v61 = vadd.f32 %v504_v53, %v503_v48 }
  0x70   : > { %v491_v22 = vadd.f32 %v490_v5, %v489_v62  ;;  %v498_v60 = vadd.f32 %v497_v39, %v496_v58  ;;  %v517_v62 = vadd.f32 %v516_v54, %v515_v1 }
  0x71   : > { %v533_v8 = vmul.f32 0.0625, %v505_v61 }
  0x72   : > { %349 = vadd.xlane.f32.xlu1 %v348_v11  ;;  %346 = vadd.xlane.f32.xlu0 %v345_v12  ;;  %v527_v11 = vmul.f32 0.0625, %v463_v6  ;;  %v771_v12 = vsel %vm716_vm1, %v525_v2, %v524_v0  ;;  %v512_v0 = vadd.f32 %v511_v56, %v510_v50  ;;  %v521_v2 = vmul.f32 0.0625, %v421_v57 }
  0x73   : > { %v772_v20 = vsel %vm718_vm2, %v526_v4, %v771_v12  ;;  %v532_v4 = vmul.f32 0.0625, %v498_v60  ;;  %v518_v5 = vrot.slane %v517_v62, 1 }
  0x74   : > { %v2939_v21 = vsel %vm720_vm3, %v527_v11, %v772_v20  ;;  %v534_v6 = vmul.f32 0.0625, %v512_v0  ;;  %v768_v11 = vsel %vm716_vm1, %v521_v2, %v520_v18 }
  0x75   : > { %v769_v12 = vsel %vm718_vm2, %v522_v3, %v768_v11  ;;  %v777_v20 = vsel %vm716_vm1, %v533_v8, %v532_v4 }
  0x76   : > { %373 = vadd.xlane.f32.xlu1 %v2917_v14  ;;  %370 = vadd.xlane.f32.xlu0 %v2920_v15  ;;  %v531_v14 = vmul.f32 0.0625, %v491_v22  ;;  %v774_v15 = vsel %vm716_vm1, %v529_v13, %v528_v10  ;;  %v435_v10 = vadd.f32 %v434_v63, %v433_v55 }
  0x77   : > { %v775_v24 = vsel %vm718_vm2, %v530_v19, %v774_v15  ;;  %v519_v19 = vadd.f32 %v518_v5, %v517_v62 }
  0x78   : > { %v2944_v25 = vsel %vm720_vm3, %v531_v14, %v775_v24  ;;  %v523_v13 = vmul.f32 0.0625, %v435_v10  ;;  %v778_v14 = vsel %vm718_vm2, %v534_v6, %v777_v20 }
  0x79   : > { %v535_v15 = vmul.f32 0.0625, %v519_v19 }
  0x7a   : > { %v2966_v22 = vsel %vm720_vm3, %v523_v13, %v769_v12 }
  0x7b   : > { %v2970_v24 = vsel %vm720_vm3, %v535_v15, %v778_v14 }
  0xc7   : > { %v287_v27 = vpop.xlane.xlu1 %286  ;;  %v281_v28 = vpop.xlane.xlu0 %280 }
  0xc8   : > { %v378_v16 = vmul.f32 0.0625, %v287_v27  ;;  %v376_v46 = vmul.f32 0.0625, %v281_v28 }
  0xca   : > { %v584_v39 = vrot.slane %v378_v16, %v2978_v9  ;;  %v573_v53 = vrot.slane %v376_v46, %v2978_v9 }
  0xcb   : > { %v290_v29 = vpop.xlane.xlu1 %289  ;;  %v284_v30 = vpop.xlane.xlu0 %283 }
  0xcc   : > { %v379_v31 = vmul.f32 0.0625, %v290_v29  ;;  %v377_v43 = vmul.f32 0.0625, %v284_v30 }
  0xce   : > { %v588_v1 = vrot.slane %v379_v31, %v2975_v42  ;;  %v578_v49 = vrot.slane %v377_v43, %v2975_v42 }
  0xcf   : > { %v308_v33 = vpop.xlane.xlu1 %307  ;;  %v305_v34 = vpop.xlane.xlu0 %304 }
  0xd0   : > { %v385_v54 = vmul.f32 0.0625, %v308_v33  ;;  %v384_v55 = vmul.f32 0.0625, %v305_v34  ;;  %v580_v62 = vsel %vm579_vm4, %v578_v49, %v573_v53  ;;  %v589_v63 = vsel %vm579_vm4, %v588_v1, %v584_v39 }
  0xd1   : > { %v717_v13 = vsel %vm716_vm1, %v589_v63, %v580_v62 }
  0xd2   : > { %v615_v3 = vrot.slane %v385_v54, %v2975_v42  ;;  %v611_v4 = vrot.slane %v384_v55, %v2978_v9 }
  0xd3   : > { %v314_v37 = vpop.xlane.xlu1 %313  ;;  %v311_v38 = vpop.xlane.xlu0 %310 }
  0xd4   : > { %v387_v26 = vmul.f32 0.0625, %v314_v37  ;;  %v386_v47 = vmul.f32 0.0625, %v311_v38  ;;  %v616_v32 = vsel %vm579_vm4, %v615_v3, %v611_v4 }
  0xd6   : > { %v624_v56 = vrot.slane %v387_v26, %v2975_v42  ;;  %v620_v57 = vrot.slane %v386_v47, %v2978_v9 }
  0xd7   : > { %v296_v23 = vpop.xlane.xlu1 %295  ;;  %v293_v41 = vpop.xlane.xlu0 %292 }
  0xd8   : > { %v381_v44 = vmul.f32 0.0625, %v296_v23  ;;  %v380_v45 = vmul.f32 0.0625, %v293_v41  ;;  %v625_v11 = vsel %vm579_vm4, %v624_v56, %v620_v57  ;;  %v2677_v57 = vmov 0.0  }
  0xd9   : > { %v722_v35 = vsel %vm716_vm1, %v625_v11, %v616_v32  ;;  %2447 = vmatprep.subr.mxu1 %v2677_v57  ;;  %2442 = vmatprep.subr.mxu0 %v2677_v57 }
  0xda   : > { %v597_v50 = vrot.slane %v381_v44, %v2975_v42  ;;  %v593_v7 = vrot.slane %v380_v45, %v2978_v9  ;;  %2449 = vmatprep.mubr.msk.f32.mxu1 %vm2678_vm6, %v2677_v57  ;;  %2444 = vmatprep.mubr.msk.f32.mxu0 %vm2678_vm6, %v2677_v57 }
  0xdb   : > { %v320_v58 = vpop.xlane.xlu1 %319  ;;  %v317_v48 = vpop.xlane.xlu0 %316 }
  0xdc   : > { %v389_v51 = vmul.f32 0.0625, %v320_v58  ;;  %v388_v52 = vmul.f32 0.0625, %v317_v48  ;;  %v598_v18 = vsel %vm579_vm4, %v597_v50, %v593_v7 }
  0xdd   : > { %v719_v14 = vsel %vm718_vm2, %v598_v18, %v717_v13 }
  0xde   : > { %v633_v0 = vrot.slane %v389_v51, %v2975_v42  ;;  %v629_v2 = vrot.slane %v388_v52, %v2978_v9 }
  0xdf   : > { %v302_v36 = vpop.xlane.xlu1 %301  ;;  %v299_v59 = vpop.xlane.xlu0 %298 }
  0xe0   : > { %v383_v60 = vmul.f32 0.0625, %v302_v36  ;;  %v382_v61 = vmul.f32 0.0625, %v299_v59  ;;  %v634_v27 = vsel %vm579_vm4, %v633_v0, %v629_v2 }
  0xe1   : > { %v723_v38 = vsel %vm718_vm2, %v634_v27, %v722_v35 }
  0xe2   : > { %v606_v8 = vrot.slane %v383_v60, %v2975_v42  ;;  %v602_v5 = vrot.slane %v382_v61, %v2978_v9 }
  0xe3   : > { %v326_v6 = vpop.xlane.xlu1 %325  ;;  %v323_v10 = vpop.xlane.xlu0 %322 }
  0xe4   : > { %v391_v12 = vmul.f32 0.0625, %v326_v6  ;;  %v390_v19 = vmul.f32 0.0625, %v323_v10  ;;  %v607_v20 = vsel %vm579_vm4, %v606_v8, %v602_v5 }
  0xe5   : > { %v3002_v15 = vsel %vm720_vm3, %v607_v20, %v719_v14 }
  0xe6   : > { %v642_v28 = vrot.slane %v391_v12, %v2975_v42  ;;  %v638_v29 = vrot.slane %v390_v19, %v2978_v9  ;;  %v736_v30 = vsel %vm735_vm5, %v3002_v15, 0.0 }
  0xe7   : > { %v332_v33 = vpop.xlane.xlu1 %331  ;;  %737 = vadd.xlane.f32.xlu0 %v736_v30  ;;  %v329_v34 = vpop.xlane.xlu0 %328 }
  0xe8   : > { %v643_v37 = vsel %vm579_vm4, %v642_v28, %v638_v29  ;;  %v393_v49 = vmul.f32 0.0625, %v332_v33  ;;  %v392_v50 = vmul.f32 0.0625, %v329_v34 }
  0xe9   : > { %v3014_v17 = vsel %vm720_vm3, %v643_v37, %v723_v38 }
  0xea   : > { %v739_v23 = vsel %vm735_vm5, %v3014_v17, 0.0  ;;  %v651_v55 = vrot.slane %v393_v49, %v2975_v42  ;;  %v647_v56 = vrot.slane %v392_v50, %v2978_v9 }
  0xeb   : > { %v338_v41 = vpop.xlane.xlu1 %337  ;;  %740 = vadd.xlane.f32.xlu1 %v739_v23  ;;  %v335_v31 = vpop.xlane.xlu0 %334 }
  0xec   : > { %v395_v47 = vmul.f32 0.0625, %v338_v41  ;;  %v394_v58 = vmul.f32 0.0625, %v335_v31  ;;  %v652_v2 = vsel %vm579_vm4, %v651_v55, %v647_v56 }
  0xee   : > { %v660_v52 = vrot.slane %v395_v47, %v2975_v42  ;;  %v656_v39 = vrot.slane %v394_v58, %v2978_v9 }
  0xef   : > { %v356_v43 = vpop.xlane.xlu1 %355  ;;  %v353_v44 = vpop.xlane.xlu0 %352 }
  0xf0   : > { %v401_v29 = vmul.f32 0.0625, %v356_v43  ;;  %v400_v30 = vmul.f32 0.0625, %v353_v44 }
  0xf2   : > { %v687_v37 = vrot.slane %v401_v29, %v2975_v42  ;;  %v683_v38 = vrot.slane %v400_v30, %v2978_v9 }
  0xf3   : > { %v362_v45 = vpop.xlane.xlu1 %361  ;;  %v359_v16 = vpop.xlane.xlu0 %358 }
  0xf4   : > { %v403_v20 = vmul.f32 0.0625, %v362_v45  ;;  %v402_v14 = vmul.f32 0.0625, %v359_v16  ;;  %v688_v31 = vsel %vm579_vm4, %v687_v37, %v683_v38 }
  0xf6   : > { %v696_v32 = vrot.slane %v403_v20, %v2975_v42  ;;  %v692_v33 = vrot.slane %v402_v14, %v2978_v9  ;;  %v2680_v20 = vmov 32  }
  0xf7   : > { %v344_v46 = vpop.xlane.xlu1 %343  ;;  %v341_v26 = vpop.xlane.xlu0 %340 }
  0xf8   : > { %v397_v48 = vmul.f32 0.0625, %v344_v46  ;;  %v396_v1 = vmul.f32 0.0625, %v341_v26  ;;  %v697_v23 = vsel %vm579_vm4, %v696_v32, %v692_v33 }
  0xf9   : > { %v728_v43 = vsel %vm716_vm1, %v697_v23, %v688_v31 }
  0xfa   : > { %v669_v53 = vrot.slane %v397_v48, %v2975_v42  ;;  %v665_v54 = vrot.slane %v396_v1, %v2978_v9 }
  0xfb   : > { %v368_v7 = vpop.xlane.xlu1 %367  ;;  %v365_v51 = vpop.xlane.xlu0 %364 }
  0xfc   : > { %782 = vrot.lane.b32.xlu1 %v2939_v21, %s2676_s29  ;;  %v661_v21 = vsel %vm579_vm4, %v660_v52, %v656_v39  ;;  %v670_v62 = vsel %vm579_vm4, %v669_v53, %v665_v54  ;;  %v405_v27 = vmul.f32 0.0625, %v368_v7  ;;  %v404_v28 = vmul.f32 0.0625, %v365_v51 }
  0xfd   : > { %v725_v4 = vsel %vm716_vm1, %v661_v21, %v652_v2  ;;  %v1110_v2 = vld [vmem:[%s3509_s3 + $0x8] sm:$0xf] }
  0xfe   : > { %v705_v34 = vrot.slane %v405_v27, %v2975_v42  ;;  %v701_v35 = vrot.slane %v404_v28, %v2978_v9 }
  0xff   : > { %v350_v36 = vpop.xlane.xlu1 %349  ;;  %v347_v59 = vpop.xlane.xlu0 %346 }
 0x100   : > { %v399_v60 = vmul.f32 0.0625, %v350_v36  ;;  %v398_v61 = vmul.f32 0.0625, %v347_v59  ;;  %784 = vrot.lane.b32.xlu1 %v2944_v25, %s2676_s29  ;;  %v726_v25 = vsel %vm718_vm2, %v670_v62, %v725_v4  ;;  %v706_v41 = vsel %vm579_vm4, %v705_v34, %v701_v35  ;;  %v1109_v59 = vld [vmem:[%s3509_s3] sm:$0xff] }
 0x101   : > { %v729_v44 = vsel %vm718_vm2, %v706_v41, %v728_v43 }
 0x102   : > { %v678_v63 = vrot.slane %v399_v60, %v2975_v42  ;;  %v674_v0 = vrot.slane %v398_v61, %v2978_v9  ;;  %v1111_v60 = vld [vmem:[%s3510_s4] sm:$0xff] }
 0x103   : > { %v374_v18 = vpop.xlane.xlu1 %373  ;;  %v371_v3 = vpop.xlane.xlu0 %370 }
 0x104   : > { %v407_v8 = vmul.f32 0.0625, %v374_v18  ;;  %v406_v5 = vmul.f32 0.0625, %v371_v3  ;;  %v679_v6 = vsel %vm579_vm4, %v678_v63, %v674_v0 }
 0x105   : > { %v727_v10 = vsel %vm720_vm3, %v679_v6, %v726_v25 }
 0x106   : > { %v714_v13 = vrot.slane %v407_v8, %v2975_v42  ;;  %v710_v11 = vrot.slane %v406_v5, %v2978_v9  ;;  %v742_v12 = vsel %vm735_vm5, %v727_v10, 0.0  ;;  %v802_v42 = vld [vmem:[%s3508_s2] sm:$0xff]  ;;  %v2679_v9 = vmov 0  }
 0x107   : > { %743 = vadd.xlane.f32.xlu0 %v742_v12  ;;  %2540 = vset.pattern.permute.xlu1 %v2679_v9 }
 0x108   : > { %v715_v19 = vsel %vm579_vm4, %v714_v13, %v710_v11  ;;  %2539 = vset.pattern.permute.xlu0 %v2679_v9  ;;  %v3121_v9 = vsub.s32 0, %v2972_v40 }
 0x109   : > { %v730_v45 = vsel %vm720_vm3, %v715_v19, %v729_v44 }
 0x10a   : > { %v745_v16 = vsel %vm735_vm5, %v730_v45, 0.0 }
 0x11d   : > { %780 = vrot.lane.b32.xlu0 %v2966_v22, %s2676_s29 }
 0x121   : > { %805 = vperm.xlu0 %2539, %v802_v42  }
 0x124   : > { %746 = vadd.xlane.f32.xlu1 %v745_v16 }
 0x125   : > { %2541 = vset.pattern.permute.xlu0 %v2680_v20 }
 0x135   : > { %786 = vrot.lane.b32.xlu1 %v2970_v24, %s2676_s29  ;;  %v801_v24 = vld [vmem:[%s3507_s1] sm:$0xff]  ;;  %s3389_s29 = scalar_lea.vmem [#allocation5], %s2386_s25  ;;  %s2421_s25 = sshll.u32 %s2737_s22, 12 }
 0x136   : > { %s2305_s12 = sshll.u32 %s3389_s29, 4  ;;  %s3456_s16 = scalar_lea.hbm %s3511_s5, %s2421_s25  ;;  %s3458_s12 = int_to_ptr.vmem [resolvable:$true] %s2305_s12 }
 0x137   : > { %s2291_s22 = scalar_lea.sflag [#allocation4], %s2820_s23  ;;  %s2605_s8 = scalar_lea.vmem %s3458_s12, 4096 }
 0x138   : > { %p2606_p6 = scmp.ne.s32.totalorder %s3458_s12, %s2605_s8  ;;  %p2612_p8 = scmp.lt.s32.totalorder %s3458_s12, %s2610_s9 }
 0x139   : > { %p2613_p10 = scmp.lt.s32.totalorder %s2611_s10, %s2605_s8 }
 0x13a   : > { %p2607_p12 = pnand %p2606_p6, %p3518_p11 }
 0x13b   : > { %p2614_p0 = por %p2613_p10, %p2612_p8 }
 0x13c   : > { %p2608_p13 = pneg %p2607_p12 }
 0x13e   : > { %p2615_p2 = pnand %p2614_p0, %p2608_p13 }
 0x174   : > { %v738_v48 = vpop.xlane.xlu0 %737 }
 0x175   : > { %v748_v49 = vmul.f32 0.0625, %v738_v48 }
 0x178   : > { %v741_v22 = vpop.xlane.xlu1 %740 }
 0x179   : > { %v749_v46 = vmul.f32 0.0625, %v741_v22 }
 0x17c   : > { %v783_v26 = vpop.permute.xlu1 %782 }
 0x17d   : > { %v793_v47 = vsel %vm278_vm0, %v3014_v17, %v783_v26 }
 0x17e   : > { %v798_v58 = vsel %vm796_vm7, %v793_v47, %v749_v46 }
 0x17f   : > { %2448 = vmatpush3.msk.msra.mxu1 %vm812_vm8, %v798_v58 }
 0x180   : > { %2450 = vmatmul.mubr.msk.f32.vlgmr.msra.gmra.mrb[0].mxu1 %vm808_vm9, %v801_v24  ;;  %2457 = vmatprep.subr.mxu1 %v2677_v57  ;;  %v785_v17 = vpop.permute.xlu1 %784 }
 0x181   : > { %2459 = vmatprep.mubr.msk.f32.mxu1 %vm2678_vm6, %v2677_v57  ;;  %v794_v39 = vsel %vm278_vm0, %v727_v10, %v785_v17 }
 0x194   : > { %v744_v1 = vpop.xlane.xlu0 %743 }
 0x195   : > { %v750_v50 = vmul.f32 0.0625, %v744_v1  ;;  %v3128_v1 = vsub.s32 1, %v2972_v40 }
 0x197   : > { %v799_v53 = vsel %vm796_vm7, %v794_v39, %v750_v50 }
 0x198   : > { %v781_v7 = vpop.permute.xlu0 %780 }
 0x199   : > { %v792_v51 = vsel %vm278_vm0, %v3002_v15, %v781_v7 }
 0x19a   : > { %v797_v52 = vsel %vm796_vm7, %v792_v51, %v748_v49  ;;  %v3133_v51 = vsub.s32 2, %v2972_v40 }
 0x19b   : > { %2443 = vmatpush3.msk.msra.mxu0 %vm812_vm8, %v797_v52 }
 0x19c   : > { %2445 = vmatmul.mubr.msk.f32.vlgmr.msra.gmra.mrb[0].mxu0 %vm808_vm9, %v801_v24  ;;  %2452 = vmatprep.subr.mxu0 %v2677_v57 }
 0x19d   : > { %2453 = vmatpush3.msk.msra.mxu0 %vm812_vm8, %v799_v53  ;;  %2454 = vmatprep.mubr.msk.f32.mxu0 %vm2678_vm6, %v2677_v57  ;;  %v1112_v57 = vld [vmem:[%s3510_s4 + $0x8] sm:$0xf]  ;;  %v3138_v53 = vsub.s32 3, %v2972_v40 }
 0x19e   : > { %1120 = vperm.xlu1 %2540, %v1112_v57  }
 0x1a0   : > { %2455 = vmatmul.mubr.msk.f32.vlgmr.msra.gmra.mrb[2].mxu0 %vm808_vm9, %v801_v24  ;;  %v806_v61 = vpop.permute.xlu0 %805 }
 0x1a1   : > { %2464 = vmatprep.mubr.msk.f32.mxu0 %vm1123_vm10, %v1109_v59 }
 0x1a2   : > { %1115 = vperm.xlu1 %2540, %v1111_v60  }
 0x1a6   : > { %2542 = vset.pattern.permute.xlu1 %v2680_v20 }
 0x1b1   : > { %v747_v15 = vpop.xlane.xlu1 %746 }
 0x1b2   : > { %v751_v54 = vmul.f32 0.0625, %v747_v15  ;;  %v2681_v15 = vmov 1966171168  }
 0x1b5   : > { %v787_v55 = vpop.permute.xlu1 %786 }
 0x1b6   : > { %v795_v56 = vsel %vm278_vm0, %v730_v45, %v787_v55 }
 0x1b7   : > { %v800_v36 = vsel %vm796_vm7, %v795_v56, %v751_v54  ;;  %v1660_v54 = vunpack.c.l.s4 %v2681_v15 }
 0x1b8   : > { %2458 = vmatpush3.msk.msra.mxu1 %vm812_vm8, %v800_v36 }
 0x1b9   : > { %2460 = vmatmul.mubr.msk.f32.vlgmr.msra.gmra.mrb[2].mxu1 %vm808_vm9, %v801_v24  ;;  %v1661_v57 = vunpack.c.0.s8 %v1660_v54 }
 0x1ba   : > { %2469 = vmatprep.mubr.msk.f32.mxu1 %vm1123_vm10, %v1109_v59 }
 0x21d   : > { %v3114_v28 = vpop.permute.xlu1 %1120 }
 0x221   : > { %v1116_v30 = vpop.permute.xlu1 %1115 }
 0x253   : > { %v955_v21 = vpop.f32.mrb[0].mxu1 }
 0x254   : > { %v956_v62 = vadd.f32 %v955_v21, %v806_v61  ;;  %v2451_v63 = vpop.f32.mrb[1].mxu1 }
 0x255   : > { %v3147_v63 = vsub.s32 %v1661_v57, %v2972_v40 }
 0x256   : > { %v1106_v0 = vmax.f32 %v956_v62, 0.0 }
 0x258   : > { %2467 = vmatprep.subr.mxu1 %v1106_v0 }
 0x259   : > { %2468 = vmatpush3.msra.mxu1 %v1106_v0 }
 0x25a   : > { %2470 = vmatmul.mubr.msk.f32.vlgmr.msra.gmra.mrb[4].mxu1 %vm1123_vm10, %v1110_v2 }
 0x25b   : > { %2479 = vmatprep.mubr.msk.f32.mxu1 %vm1123_vm10, %v1109_v59 }
 0x26f   : > { %v882_v18 = vpop.f32.mrb[0].mxu0 }
 0x270   : > { %v883_v3 = vadd.f32 %v882_v18, %v806_v61  ;;  %v2446_v4 = vpop.f32.mrb[1].mxu0 }
 0x272   : > { %v1105_v8 = vmax.f32 %v883_v3, 0.0 }
 0x273   : > { %v1028_v5 = vpop.f32.mrb[2].mxu0 }
 0x274   : > { %v1029_v6 = vadd.f32 %v1028_v5, %v806_v61  ;;  %2462 = vmatprep.subr.mxu0 %v1105_v8  ;;  %v2456_v25 = vpop.f32.mrb[3].mxu0 }
 0x275   : > { %2463 = vmatpush3.msra.mxu0 %v1105_v8 }
 0x276   : > { %v1107_v10 = vmax.f32 %v1029_v6, 0.0  ;;  %2465 = vmatmul.mubr.msk.f32.vlgmr.msra.gmra.mrb[4].mxu0 %vm1123_vm10, %v1110_v2 }
 0x277   : > { %2474 = vmatprep.mubr.msk.f32.mxu0 %vm1123_vm10, %v1109_v59 }
 0x278   : > { %2472 = vmatprep.subr.mxu0 %v1107_v10 }
 0x279   : > { %2473 = vmatpush3.msra.mxu0 %v1107_v10 }
 0x27a   : > { %2475 = vmatmul.mubr.msk.f32.vlgmr.msra.gmra.mrb[6].mxu0 %vm1123_vm10, %v1110_v2 }
 0x28c   : > { %v1101_v13 = vpop.f32.mrb[2].mxu1 }
 0x28d   : > { %v1102_v11 = vadd.f32 %v1101_v13, %v806_v61  ;;  %v2461_v12 = vpop.f32.mrb[3].mxu1 }
 0x28f   : > { %v1108_v19 = vmax.f32 %v1102_v11, 0.0 }
 0x291   : > { %2477 = vmatprep.subr.mxu1 %v1108_v19 }
 0x292   : > { %2478 = vmatpush3.msra.mxu1 %v1108_v19 }
 0x293   : > { %2480 = vmatmul.mubr.msk.f32.vlgmr.msra.gmra.mrb[6].mxu1 %vm1123_vm10, %v1110_v2 }
 0x32d   : > { %v2471_v14 = vpop.f32.mrb[4].mxu1 }
 0x32e   : > { %v1271_v27 = vpop.f32.mrb[5].mxu1  ;;  %v1277_v41 = vadd.f32 %v2471_v14, %v3114_v28 }
 0x32f   : > { %v1272_v38 = vadd.f32 %v1271_v27, %v1116_v30 }
 0x330   : > { %v2407_v45 = vmul.f32 -1.442695, %v1277_v41 }
 0x331   : > { %v2406_v23 = vmul.f32 -1.442695, %v1272_v38 }
 0x349   : > { %v2466_v29 = vpop.f32.mrb[4].mxu0 }
 0x34a   : > { %v1196_v32 = vpop.f32.mrb[5].mxu0  ;;  %v1202_v43 = vadd.f32 %v2466_v29, %v3114_v28 }
 0x34b   : > { %v1197_v33 = vadd.f32 %v1196_v32, %v1116_v30 }
 0x34c   : > { %v2405_v16 = vmul.f32 -1.442695, %v1202_v43 }
 0x34d   : > { %v2404_v34 = vmul.f32 -1.442695, %v1197_v33  ;;  %v3116_v35 = vpop.f32.mrb[6].mxu0 }
 0x34e   : > { %v1346_v37 = vpop.f32.mrb[7].mxu0  ;;  %v1352_v6 = vadd.f32 %v3116_v35, %v3114_v28 }
 0x34f   : > { %2543 = vpow2.f32 %v2404_v34  ;;  %v1347_v22 = vadd.f32 %v1346_v37, %v1116_v30 }
 0x350   : > { %2545 = vpow2.f32 %v2406_v23  ;;  %v2409_v12 = vmul.f32 -1.442695, %v1352_v6 }
 0x351   : > { %v2408_v48 = vmul.f32 -1.442695, %v1347_v22 }
 0x359   : > { %v2544_v31 = vpop.eup %2543 }
 0x35a   : > { %v1454_v44 = vadd.f32 1.0, %v2544_v31  ;;  %v2546_v42 = vpop.eup %2545 }
 0x35b   : > { %v1456_v26 = vadd.f32 1.0, %v2546_v42 }
 0x35c   : > { %2547 = vrcp.f32 %v1454_v44 }
 0x35d   : > { %2549 = vpow2.f32 %v2407_v45 }
 0x35e   : > { %2551 = vpow2.f32 %v2405_v16 }
 0x35f   : > { %2553 = vrcp.f32 %v1456_v26 }
 0x360   : > { %2555 = vpow2.f32 %v2408_v48 }
 0x366   : > { %v3123_v46 = vpop.eup %2547  ;;  %v2481_v47 = vpop.f32.mrb[6].mxu1 }
 0x367   : > { %v1421_v24 = vpop.f32.mrb[7].mxu1  ;;  %v1481_v58 = vrot.slane %v3123_v46, %v3121_v9  ;;  %v2550_v49 = vpop.eup %2549  ;;  %v1492_v50 = vrot.slane %v3123_v46, %v3128_v1  ;;  %v1503_v39 = vrot.slane %v3123_v46, %v3133_v51  ;;  %v1514_v55 = vrot.slane %v3123_v46, %v3138_v53 }
 0x368   : > { %v2552_v17 = vpop.eup %2551  ;;  %v1457_v7 = vadd.f32 1.0, %v2550_v49  ;;  %v1422_v36 = vadd.f32 %v1421_v24, %v1116_v30  ;;  %v1427_v19 = vadd.f32 %v2481_v47, %v3114_v28 }
 0x369   : > { %1487 = vbcast.lane.b32.xlu1 %v1481_v58, 264  ;;  %1483 = vbcast.lane.b32.xlu0 %v1481_v58, 256  ;;  %v1455_v52 = vadd.f32 1.0, %v2552_v17  ;;  %v3142_v56 = vpop.eup %2553 }
 0x36a   : > { %2557 = vrcp.f32 %v1457_v7  ;;  %v2556_v59 = vpop.eup %2555  ;;  %v1525_v60 = vrot.slane %v3142_v56, %v3121_v9  ;;  %v2410_v61 = vmul.f32 -1.442695, %v1422_v36  ;;  %v1536_v0 = vrot.slane %v3142_v56, %v3128_v1 }
 0x36b   : > { %2559 = vrcp.f32 %v1455_v52  ;;  %v1458_v21 = vadd.f32 1.0, %v2556_v59  ;;  %v1547_v18 = vrot.slane %v3142_v56, %v3133_v51  ;;  %v1558_v40 = vrot.slane %v3142_v56, %v3138_v53 }
 0x36c   : > { %2561 = vpow2.f32 %v2410_v61  ;;  %v2411_v27 = vmul.f32 -1.442695, %v1427_v19 }
 0x36d   : > { %1498 = vbcast.lane.b32.xlu1 %v1492_v50, 264  ;;  %1494 = vbcast.lane.b32.xlu0 %v1492_v50, 256  ;;  %2563 = vrcp.f32 %v1458_v21 }
 0x36e   : > { %2565 = vpow2.f32 %v2409_v12 }
 0x371   : > { %1509 = vbcast.lane.b32.xlu1 %v1503_v39, 264  ;;  %1505 = vbcast.lane.b32.xlu0 %v1503_v39, 256 }
 0x374   : > { %v2558_v62 = vpop.eup %2557 }
 0x375   : > { %1520 = vbcast.lane.b32.xlu1 %v1514_v55, 264  ;;  %1516 = vbcast.lane.b32.xlu0 %v1514_v55, 256  ;;  %v2560_v2 = vpop.eup %2559  ;;  %v1904_v3 = vrot.slane %v2558_v62, %v3147_v63 }
 0x376   : > { %v1880_v4 = vrot.slane %v2560_v2, %v3147_v63  ;;  %v2562_v25 = vpop.eup %2561 }
 0x377   : > { %v3158_v8 = vrot.slane %v1904_v3, %v3147_v63  ;;  %v3169_v11 = vpop.eup %2563  ;;  %v1460_v20 = vadd.f32 1.0, %v2562_v25  ;;  %v1905_v41 = vcombine.high %v1904_v3, %v1904_v3 }
 0x378   : > { %v3161_v5 = vrot.slane %v1880_v4, %v3147_v63  ;;  %v1569_v14 = vrot.slane %v3169_v11, %v3121_v9  ;;  %v1580_v29 = vrot.slane %v3169_v11, %v3128_v1  ;;  %v1591_v28 = vrot.slane %v3169_v11, %v3133_v51  ;;  %v2566_v30 = vpop.eup %2565 }
 0x379   : > { %1531 = vbcast.lane.b32.xlu1 %v1525_v60, 264  ;;  %1527 = vbcast.lane.b32.xlu0 %v1525_v60, 256  ;;  %v1989_v10 = vrot.slane %v3158_v8, %v3121_v9  ;;  %2567 = vrcp.f32 %v1460_v20  ;;  %v1602_v32 = vrot.slane %v3169_v11, %v3138_v53  ;;  %v1459_v34 = vadd.f32 1.0, %v2566_v30 }
 0x37a   : > { %v1973_v13 = vrot.slane %v3161_v5, %v3121_v9  ;;  %2569 = vpow2.f32 %v2411_v27  ;;  %v1881_v43 = vcombine.high %v1880_v4, %v1880_v4  ;;  %v1919_v44 = vrot.slane %v1905_v41, %v3147_v63 }
 0x37b   : > { %2571 = vrcp.f32 %v1459_v34  ;;  %v1896_v47 = vcombine.high %v3161_v5, %v3161_v5 }
 0x37c   : > { %v1895_v16 = vrot.slane %v1881_v43, %v3147_v63  ;;  %v1993_v22 = vrot.slane %v1919_v44, %v3121_v9  ;;  %v1921_v49 = vcombine.high %v1919_v44, %v1919_v44 }
 0x37d   : > { %1542 = vbcast.lane.b32.xlu1 %v1536_v0, 264  ;;  %1538 = vbcast.lane.b32.xlu0 %v1536_v0, 256  ;;  %v1981_v17 = vrot.slane %v1896_v47, %v3121_v9 }
 0x37e   : > { %v1977_v26 = vrot.slane %v1895_v16, %v3121_v9  ;;  %v1897_v24 = vcombine.high %v1895_v16, %v1895_v16  ;;  %v2001_v39 = vrot.slane %v1921_v49, %v3121_v9 }
 0x380   : > { %v1985_v50 = vrot.slane %v1897_v24, %v3121_v9 }
 0x381   : > { %1553 = vbcast.lane.b32.xlu1 %v1547_v18, 264  ;;  %1549 = vbcast.lane.b32.xlu0 %v1547_v18, 256 }
 0x383   : > { %v3180_v33 = vpop.eup %2567 }
 0x384   : > { %v2570_v35 = vpop.eup %2569  ;;  %v1613_v37 = vrot.slane %v3180_v33, %v3121_v9  ;;  %v1624_v23 = vrot.slane %v3180_v33, %v3128_v1  ;;  %v1635_v31 = vrot.slane %v3180_v33, %v3133_v51  ;;  %v1646_v45 = vrot.slane %v3180_v33, %v3138_v53 }
 0x385   : > { %1564 = vbcast.lane.b32.xlu1 %v1558_v40, 264  ;;  %1560 = vbcast.lane.b32.xlu0 %v1558_v40, 256  ;;  %v1461_v38 = vadd.f32 1.0, %v2570_v35  ;;  %v2572_v42 = vpop.eup %2571  ;;  %v1920_v1 = vcombine.high %v3158_v8, %v3158_v8  ;;  %v1658_v8 = vcombine.high %v3123_v46, %v3123_v46 }
 0x386   : > { %v1928_v58 = vrot.slane %v2572_v42, %v3147_v63 }
 0x387   : > { %2573 = vrcp.f32 %v1461_v38  ;;  %v1997_v52 = vrot.slane %v1920_v1, %v3121_v9  ;;  %v1665_v5 = vrot.slane %v1658_v8, %v3147_v63 }
 0x388   : > { %v1929_v7 = vcombine.high %v1928_v58, %v1928_v58  ;;  %v1936_v53 = vrot.slane %v1928_v58, %v3147_v63 }
 0x389   : > { %2051 = vperm.xlu1 %2542, %v1989_v10   ;;  %2035 = vperm.xlu0 %2541, %v1973_v13   ;;  %v1666_v6 = vcombine.high %v1665_v5, %v1665_v5  ;;  %v1673_v43 = vrot.slane %v1665_v5, %v3147_v63 }
 0x38a   : > { %v1943_v15 = vrot.slane %v1929_v7, %v3147_v63  ;;  %v2005_v55 = vrot.slane %v1936_v53, %v3121_v9  ;;  %v1944_v21 = vcombine.high %v1936_v53, %v1936_v53 }
 0x38b   : > { %v1680_v13 = vrot.slane %v1666_v6, %v3147_v63  ;;  %v1681_v6 = vcombine.high %v1673_v43, %v1673_v43 }
 0x38c   : > { %v2009_v36 = vrot.slane %v1943_v15, %v3121_v9  ;;  %v1945_v62 = vcombine.high %v1943_v15, %v1943_v15  ;;  %v2013_v0 = vrot.slane %v1944_v21, %v3121_v9 }
 0x38d   : > { %1575 = vbcast.lane.b32.xlu1 %v1569_v14, 264  ;;  %1571 = vbcast.lane.b32.xlu0 %v1569_v14, 256  ;;  %v1682_v20 = vcombine.high %v1680_v13, %v1680_v13  ;;  %v1765_v5 = vrot.slane %v1680_v13, %v3121_v9 }
 0x38e   : > { %v2017_v2 = vrot.slane %v1945_v62, %v3121_v9 }
 0x391   : > { %1586 = vbcast.lane.b32.xlu1 %v1580_v29, 264  ;;  %1582 = vbcast.lane.b32.xlu0 %v1580_v29, 256  ;;  %v2574_v48 = vpop.eup %2573  ;;  %v1773_v29 = vrot.slane %v1682_v20, %v3121_v9 }
 0x392   : > { %v1952_v51 = vrot.slane %v2574_v48, %v3147_v63 }
 0x394   : > { %v1953_v54 = vcombine.high %v1952_v51, %v1952_v51  ;;  %v1960_v59 = vrot.slane %v1952_v51, %v3147_v63 }
 0x395   : > { %1597 = vbcast.lane.b32.xlu1 %v1591_v28, 264  ;;  %1593 = vbcast.lane.b32.xlu0 %v1591_v28, 256 }
 0x396   : > { %v1967_v57 = vrot.slane %v1953_v54, %v3147_v63  ;;  %v2021_v60 = vrot.slane %v1960_v59, %v3121_v9  ;;  %v1968_v18 = vcombine.high %v1960_v59, %v1960_v59 }
 0x398   : > { %v2025_v61 = vrot.slane %v1967_v57, %v3121_v9  ;;  %v1969_v3 = vcombine.high %v1967_v57, %v1967_v57  ;;  %v2029_v4 = vrot.slane %v1968_v18, %v3121_v9 }
 0x399   : > { %1608 = vbcast.lane.b32.xlu1 %v1602_v32, 264  ;;  %1604 = vbcast.lane.b32.xlu0 %v1602_v32, 256 }
 0x39a   : > { %v2033_v40 = vrot.slane %v1969_v3, %v3121_v9 }
 0x39d   : > { %1619 = vbcast.lane.b32.xlu1 %v1613_v37, 264  ;;  %1615 = vbcast.lane.b32.xlu0 %v1613_v37, 256 }
 0x3a1   : > { %1630 = vbcast.lane.b32.xlu1 %v1624_v23, 264  ;;  %1626 = vbcast.lane.b32.xlu0 %v1624_v23, 256  ;;  %v1683_v23 = vcombine.high %v3142_v56, %v3142_v56 }
 0x3a3   : > { %v1690_v44 = vrot.slane %v1683_v23, %v3147_v63 }
 0x3a5   : > { %1641 = vbcast.lane.b32.xlu1 %v1635_v31, 264  ;;  %1637 = vbcast.lane.b32.xlu0 %v1635_v31, 256 }
 0x3a9   : > { %1652 = vbcast.lane.b32.xlu1 %v1646_v45, 264  ;;  %1648 = vbcast.lane.b32.xlu0 %v1646_v45, 256  ;;  %v1708_v45 = vcombine.high %v3169_v11, %v3169_v11 }
 0x3ab   : > { %v3256_v24 = vrot.slane %v1708_v45, %v3147_v63 }
 0x3ad   : > { %2039 = vperm.xlu1 %2542, %v1977_v26   ;;  %2055 = vperm.xlu0 %2541, %v1993_v22   ;;  %v1761_v22 = vrot.slane %v1673_v43, %v3121_v9  ;;  %v3253_v26 = vrot.slane %v1690_v44, %v3147_v63  ;;  %v1716_v7 = vcombine.high %v3256_v24, %v3256_v24 }
 0x3af   : > { %v1777_v1 = vrot.slane %v3253_v26, %v3121_v9  ;;  %v3271_v15 = vrot.slane %v1716_v7, %v3147_v63 }
 0x3b1   : > { %2043 = vperm.xlu1 %2542, %v1981_v17   ;;  %2047 = vperm.xlu0 %2541, %v1985_v50  }
 0x3b5   : > { %2059 = vperm.xlu1 %2542, %v1997_v52   ;;  %2063 = vperm.xlu0 %2541, %v2001_v39  }
 0x3b9   : > { %2067 = vperm.xlu1 %2542, %v2005_v55   ;;  %2071 = vperm.xlu0 %2541, %v2009_v36   ;;  %v1732_v36 = vcombine.high %v3271_v15, %v3271_v15 }
 0x3bd   : > { %2083 = vperm.xlu1 %2542, %v2021_v60   ;;  %2087 = vperm.xlu0 %2541, %v2025_v61   ;;  %v3284_v60 = vrot.slane %v1732_v36, %v3121_v9 }
 0x3c1   : > { %2075 = vperm.xlu1 %2542, %v2013_v0   ;;  %2079 = vperm.xlu0 %2541, %v2017_v2  }
 0x3c5   : > { %2091 = vperm.xlu1 %2542, %v2029_v4   ;;  %2095 = vperm.xlu0 %2541, %v2033_v40  }
 0x3db   : > { %v1488_v25 = vpop.permute.xlu1 %1487  ;;  %v1484_v10 = vpop.permute.xlu0 %1483 }
 0x3dc   : > { %v1839_v56 = vmul.f32 %v1761_v22, %v1488_v25  ;;  %v1838_v47 = vmul.f32 %v1761_v22, %v1484_v10  ;;  %v1691_v25 = vcombine.high %v1690_v44, %v1690_v44 }
 0x3df   : > { %v3220_v12 = vpop.permute.xlu1 %1498  ;;  %v3222_v19 = vpop.permute.xlu0 %1494 }
 0x3e0   : > { %v1841_v10 = vmul.f32 %v1765_v5, %v3220_v12  ;;  %v1840_v20 = vmul.f32 %v1765_v5, %v3222_v19  ;;  %v1706_v19 = vcombine.high %v3253_v26, %v3253_v26 }
 0x3e3   : > { %v3224_v14 = vpop.permute.xlu1 %1509  ;;  %v3226_v27 = vpop.permute.xlu0 %1505 }
 0x3e7   : > { %v1521_v28 = vpop.permute.xlu1 %1520  ;;  %v1517_v46 = vpop.permute.xlu0 %1516 }
 0x3e8   : > { %v3229_v30 = vmul.f32 %v1773_v29, %v1521_v28  ;;  %v3231_v32 = vmul.f32 %v1773_v29, %v1517_v46  ;;  %v1769_v46 = vrot.slane %v1681_v6, %v3121_v9 }
 0x3ea   : > { %v1843_v45 = vmul.f32 %v1769_v46, %v3224_v14  ;;  %v1842_v22 = vmul.f32 %v1769_v46, %v3226_v27  ;;  %v1785_v14 = vrot.slane %v1706_v19, %v3121_v9 }
 0x3eb   : > { %v1532_v34 = vpop.permute.xlu1 %1531  ;;  %v1528_v35 = vpop.permute.xlu0 %1527 }
 0x3ec   : > { %v1847_v17 = vmul.f32 %v1777_v1, %v1532_v34  ;;  %v1846_v50 = vmul.f32 %v1777_v1, %v1528_v35  ;;  %v1705_v34 = vrot.slane %v1691_v25, %v3147_v63 }
 0x3ee   : > { %v1781_v12 = vrot.slane %v1705_v34, %v3121_v9 }
 0x3ef   : > { %v3233_v37 = vpop.permute.xlu1 %1542  ;;  %v3235_v38 = vpop.permute.xlu0 %1538 }
 0x3f3   : > { %v3239_v41 = vpop.permute.xlu1 %1553  ;;  %v3241_v31 = vpop.permute.xlu0 %1549 }
 0x3f4   : > { %v1850_v26 = vmul.f32 %v1785_v14, %v3241_v31 }
 0x3f7   : > { %v3247_v16 = vpop.permute.xlu1 %1564  ;;  %v3249_v42 = vpop.permute.xlu0 %1560 }
 0x408   : > { %v2052_v58 = vpop.permute.xlu1 %2051  ;;  %v2036_v48 = vpop.permute.xlu0 %2035 }
 0x409   : > { %v2098_v11 = vmul.f32 %v2036_v48, %v1838_v47  ;;  %v2099_v49 = vmul.f32 %v2036_v48, %v1839_v56  ;;  %v2106_v39 = vmul.f32 %v2052_v58, %v1846_v50  ;;  %v2107_v53 = vmul.f32 %v2052_v58, %v1847_v17 }
 0x40a   : > { %v1849_v47 = vmul.f32 %v1781_v12, %v3233_v37  ;;  %v1848_v58 = vmul.f32 %v1781_v12, %v3235_v38  ;;  %v1707_v37 = vcombine.high %v1705_v34, %v1705_v34  ;;  %v1733_v38 = vcombine.high %v3180_v33, %v3180_v33 }
 0x40b   : > { %2164 = vrot.lane.b32.xlu0 %v2099_v49, %s2682_s28  ;;  %2162 = vrot.lane.b32.xlu1 %v2098_v11, %s2682_s28  ;;  %v1851_v11 = vmul.f32 %v1785_v14, %v3239_v41  ;;  %v1723_v41 = vrot.slane %v3256_v24, %v3147_v63 }
 0x40c   : > { %v3264_v51 = vpop.permute.xlu1 %1575  ;;  %v3266_v52 = vpop.permute.xlu0 %1571  ;;  %v1789_v7 = vrot.slane %v1707_v37, %v3121_v9  ;;  %v1740_v31 = vrot.slane %v1733_v38, %v3147_v63 }
 0x40d   : > { %v1793_v6 = vrot.slane %v1723_v41, %v3121_v9 }
 0x40e   : > { %v1853_v33 = vmul.f32 %v1789_v7, %v3247_v16  ;;  %v1748_v24 = vrot.slane %v1740_v31, %v3147_v63 }
 0x40f   : > { %2180 = vrot.lane.b32.xlu0 %v2107_v53, %s2682_s28  ;;  %2178 = vrot.lane.b32.xlu1 %v2106_v39, %s2682_s28 }
 0x410   : > { %v3273_v54 = vpop.permute.xlu1 %1586  ;;  %v3275_v55 = vpop.permute.xlu0 %1582  ;;  %v1809_v16 = vrot.slane %v1748_v24, %v3121_v9 }
 0x414   : > { %v3279_v59 = vpop.permute.xlu1 %1597  ;;  %v3281_v57 = vpop.permute.xlu0 %1593 }
 0x418   : > { %v1609_v61 = vpop.permute.xlu1 %1608  ;;  %v3286_v21 = vpop.permute.xlu0 %1604 }
 0x419   : > { %v3289_v62 = vmul.f32 %v3284_v60, %v1609_v61  ;;  %v1852_v61 = vmul.f32 %v1789_v7, %v3249_v42  ;;  %v1860_v38 = vmul.f32 %v3284_v60, %v3286_v21 }
 0x41c   : > { %v3291_v0 = vpop.permute.xlu1 %1619  ;;  %v3293_v2 = vpop.permute.xlu0 %1615 }
 0x41d   : > { %v1863_v46 = vmul.f32 %v1809_v16, %v3291_v0  ;;  %v1862_v34 = vmul.f32 %v1809_v16, %v3293_v2 }
 0x420   : > { %v3295_v18 = vpop.permute.xlu1 %1630  ;;  %v3297_v3 = vpop.permute.xlu0 %1626 }
 0x424   : > { %v3299_v4 = vpop.permute.xlu1 %1641  ;;  %v3301_v40 = vpop.permute.xlu0 %1637 }
 0x428   : > { %v3303_v8 = vpop.permute.xlu1 %1652  ;;  %v3308_v29 = vpop.permute.xlu0 %1648 }
 0x42c   : > { %v2040_v28 = vpop.permute.xlu1 %2039  ;;  %v2056_v56 = vpop.permute.xlu0 %2055 }
 0x42d   : > { %v2100_v35 = vmul.f32 %v2040_v28, %v1840_v20  ;;  %v2101_v23 = vmul.f32 %v2040_v28, %v1841_v10  ;;  %v2108_v27 = vmul.f32 %v2056_v56, %v1848_v58  ;;  %v2109_v48 = vmul.f32 %v2056_v56, %v1849_v47 }
 0x42f   : > { %2168 = vrot.lane.b32.xlu0 %v2101_v23, %s2682_s28  ;;  %2166 = vrot.lane.b32.xlu1 %v2100_v35, %s2682_s28  ;;  %v1741_v35 = vcombine.high %v1740_v31, %v1740_v31 }
 0x430   : > { %v2044_v13 = vpop.permute.xlu1 %2043  ;;  %v2048_v49 = vpop.permute.xlu0 %2047 }
 0x431   : > { %v2102_v43 = vmul.f32 %v2044_v13, %v1842_v22  ;;  %v2103_v44 = vmul.f32 %v2044_v13, %v1843_v45  ;;  %v2104_v39 = vmul.f32 %v2048_v49, %v3231_v32  ;;  %v2105_v53 = vmul.f32 %v2048_v49, %v3229_v30 }
 0x432   : > { %v1855_v32 = vmul.f32 %v1793_v6, %v3264_v51  ;;  %v1854_v30 = vmul.f32 %v1793_v6, %v3266_v52  ;;  %v1731_v51 = vcombine.high %v1723_v41, %v1723_v41  ;;  %v1797_v52 = vrot.slane %v3271_v15, %v3121_v9 }
 0x433   : > { %2172 = vrot.lane.b32.xlu0 %v2103_v44, %s2682_s28  ;;  %2170 = vrot.lane.b32.xlu1 %v2102_v43, %s2682_s28  ;;  %v1755_v2 = vrot.slane %v1741_v35, %v3147_v63 }
 0x434   : > { %v2060_v1 = vpop.permute.xlu1 %2059  ;;  %v2064_v36 = vpop.permute.xlu0 %2063  ;;  %v1857_v13 = vmul.f32 %v1797_v52, %v3273_v54  ;;  %v1856_v12 = vmul.f32 %v1797_v52, %v3275_v55  ;;  %v1801_v0 = vrot.slane %v1731_v51, %v3121_v9  ;;  %v1756_v55 = vcombine.high %v1748_v24, %v1748_v24 }
 0x435   : > { %v2110_v17 = vmul.f32 %v2060_v1, %v1850_v26  ;;  %v2111_v50 = vmul.f32 %v2060_v1, %v1851_v11  ;;  %v2112_v25 = vmul.f32 %v2064_v36, %v1852_v61  ;;  %v2113_v10 = vmul.f32 %v2064_v36, %v1853_v33 }
 0x436   : > { %v1859_v15 = vmul.f32 %v1801_v0, %v3279_v59  ;;  %v1858_v56 = vmul.f32 %v1801_v0, %v3281_v57  ;;  %v1813_v54 = vrot.slane %v1755_v2, %v3121_v9  ;;  %v1817_v59 = vrot.slane %v1756_v55, %v3121_v9 }
 0x437   : > { %2184 = vrot.lane.b32.xlu0 %v2109_v48, %s2682_s28  ;;  %2182 = vrot.lane.b32.xlu1 %v2108_v27, %s2682_s28  ;;  %v1757_v37 = vcombine.high %v1755_v2, %v1755_v2 }
 0x438   : > { %v2068_v5 = vpop.permute.xlu1 %2067  ;;  %v2072_v22 = vpop.permute.xlu0 %2071  ;;  %v1865_v27 = vmul.f32 %v1813_v54, %v3295_v18  ;;  %v1864_v63 = vmul.f32 %v1813_v54, %v3297_v3  ;;  %v1867_v11 = vmul.f32 %v1817_v59, %v3299_v4  ;;  %v1866_v26 = vmul.f32 %v1817_v59, %v3301_v40 }
 0x439   : > { %v2114_v42 = vmul.f32 %v2068_v5, %v1854_v30  ;;  %v2115_v20 = vmul.f32 %v2068_v5, %v1855_v32  ;;  %v2116_v19 = vmul.f32 %v2072_v22, %v1856_v12  ;;  %v2117_v43 = vmul.f32 %v2072_v22, %v1857_v13 }
 0x43a   : > { %v1821_v4 = vrot.slane %v1757_v37, %v3121_v9 }
 0x43b   : > { %2188 = vrot.lane.b32.xlu0 %v2111_v50, %s2682_s28  ;;  %2186 = vrot.lane.b32.xlu1 %v2110_v17, %s2682_s28 }
 0x43c   : > { %v2084_v28 = vpop.permute.xlu1 %2083  ;;  %v2088_v14 = vpop.permute.xlu0 %2087  ;;  %v1869_v7 = vmul.f32 %v1821_v4, %v3303_v8  ;;  %v1868_v41 = vmul.f32 %v1821_v4, %v3308_v29 }
 0x43d   : > { %v2122_v23 = vmul.f32 %v2084_v28, %v1862_v34  ;;  %v2123_v45 = vmul.f32 %v2084_v28, %v1863_v46  ;;  %v2124_v57 = vmul.f32 %v2088_v14, %v1864_v63  ;;  %v2125_v48 = vmul.f32 %v2088_v14, %v1865_v27 }
 0x43f   : > { %2176 = vrot.lane.b32.xlu0 %v2105_v53, %s2682_s28  ;;  %2174 = vrot.lane.b32.xlu1 %v2104_v39, %s2682_s28 }
 0x440   : > { %v2076_v44 = vpop.permute.xlu1 %2075  ;;  %v2080_v18 = vpop.permute.xlu0 %2079 }
 0x441   : > { %v2118_v47 = vmul.f32 %v2076_v44, %v1858_v56  ;;  %v2119_v58 = vmul.f32 %v2076_v44, %v1859_v15  ;;  %v2120_v17 = vmul.f32 %v2080_v18, %v1860_v38  ;;  %v2121_v40 = vmul.f32 %v2080_v18, %v3289_v62 }
 0x443   : > { %2192 = vrot.lane.b32.xlu0 %v2113_v10, %s2682_s28  ;;  %2190 = vrot.lane.b32.xlu1 %v2112_v25, %s2682_s28 }
 0x444   : > { %v2092_v1 = vpop.permute.xlu1 %2091  ;;  %v2096_v50 = vpop.permute.xlu0 %2095 }
 0x445   : > { %v2126_v3 = vmul.f32 %v2092_v1, %v1866_v26  ;;  %v2127_v49 = vmul.f32 %v2092_v1, %v1867_v11  ;;  %v2128_v60 = vmul.f32 %v2096_v50, %v1868_v41  ;;  %v2129_v21 = vmul.f32 %v2096_v50, %v1869_v7 }
 0x447   : > { %2196 = vrot.lane.b32.xlu0 %v2115_v20, %s2682_s28  ;;  %2194 = vrot.lane.b32.xlu1 %v2114_v42, %s2682_s28 }
 0x44b   : > { %2212 = vrot.lane.b32.xlu0 %v2123_v45, %s2682_s28  ;;  %2210 = vrot.lane.b32.xlu1 %v2122_v23, %s2682_s28 }
 0x44f   : > { %2200 = vrot.lane.b32.xlu0 %v2117_v43, %s2682_s28  ;;  %2198 = vrot.lane.b32.xlu1 %v2116_v19, %s2682_s28 }
 0x453   : > { %2204 = vrot.lane.b32.xlu0 %v2119_v58, %s2682_s28  ;;  %2202 = vrot.lane.b32.xlu1 %v2118_v47, %s2682_s28 }
 0x457   : > { %2216 = vrot.lane.b32.xlu0 %v2125_v48, %s2682_s28  ;;  %2214 = vrot.lane.b32.xlu1 %v2124_v57, %s2682_s28 }
 0x45b   : > { %2220 = vrot.lane.b32.xlu0 %v2127_v49, %s2682_s28  ;;  %2218 = vrot.lane.b32.xlu1 %v2126_v3, %s2682_s28 }
 0x45f   : > { %2208 = vrot.lane.b32.xlu0 %v2121_v40, %s2682_s28  ;;  %2206 = vrot.lane.b32.xlu1 %v2120_v17, %s2682_s28 }
 0x463   : > { %2224 = vrot.lane.b32.xlu0 %v2129_v21, %s2682_s28  ;;  %2222 = vrot.lane.b32.xlu1 %v2128_v60, %s2682_s28 }
 0x47d   : > { %v2163_v31 = vpop.permute.xlu1 %2162  ;;  %v2165_v9 = vpop.permute.xlu0 %2164 }
 0x47e   : > { %2258 = vst.msk [vmem:[%s3389_s29] sm:$0xff] %vm278_vm0, %v2163_v31  ;;  %2259 = vst.msk [vmem:[%s3389_s29 + $0x8] sm:$0xff] %vm278_vm0, %v2165_v9 }
 0x481   : > { %v2179_v62 = vpop.permute.xlu1 %2178  ;;  %v2181_v8 = vpop.permute.xlu0 %2180 }
 0x482   : > { %2266 = vst.msk [vmem:[%s3389_s29 + $0x40] sm:$0xff] %vm278_vm0, %v2179_v62  ;;  %2267 = vst.msk [vmem:[%s3389_s29 + $0x48] sm:$0xff] %vm278_vm0, %v2181_v8 }
 0x4a1   : > { %v2167_v29 = vpop.permute.xlu1 %2166  ;;  %v2169_v39 = vpop.permute.xlu0 %2168 }
 0x4a2   : > { %2260 = vst.msk [vmem:[%s3389_s29 + $0x10] sm:$0xff] %vm278_vm0, %v2167_v29  ;;  %2261 = vst.msk [vmem:[%s3389_s29 + $0x18] sm:$0xff] %vm278_vm0, %v2169_v39 }
 0x4a5   : > { %v2171_v53 = vpop.permute.xlu1 %2170  ;;  %v2173_v36 = vpop.permute.xlu0 %2172 }
 0x4a6   : > { %2262 = vst.msk [vmem:[%s3389_s29 + $0x20] sm:$0xff] %vm278_vm0, %v2171_v53  ;;  %2263 = vst.msk [vmem:[%s3389_s29 + $0x28] sm:$0xff] %vm278_vm0, %v2173_v36 }
 0x4a9   : > { %v2183_v33 = vpop.permute.xlu1 %2182  ;;  %v2185_v61 = vpop.permute.xlu0 %2184 }
 0x4aa   : > { %2268 = vst.msk [vmem:[%s3389_s29 + $0x50] sm:$0xff] %vm278_vm0, %v2183_v33  ;;  %2269 = vst.msk [vmem:[%s3389_s29 + $0x58] sm:$0xff] %vm278_vm0, %v2185_v61 }
 0x4ad   : > { %v2187_v5 = vpop.permute.xlu1 %2186  ;;  %v2189_v6 = vpop.permute.xlu0 %2188 }
 0x4ae   : > { %2270 = vst.msk [vmem:[%s3389_s29 + $0x60] sm:$0xff] %vm278_vm0, %v2187_v5  ;;  %2271 = vst.msk [vmem:[%s3389_s29 + $0x68] sm:$0xff] %vm278_vm0, %v2189_v6 }
 0x4b1   : > { %v2175_v24 = vpop.permute.xlu1 %2174  ;;  %v2177_v25 = vpop.permute.xlu0 %2176 }
 0x4b2   : > { %2264 = vst.msk [vmem:[%s3389_s29 + $0x30] sm:$0xff] %vm278_vm0, %v2175_v24  ;;  %2265 = vst.msk [vmem:[%s3389_s29 + $0x38] sm:$0xff] %vm278_vm0, %v2177_v25 }
 0x4b5   : > { %v2191_v10 = vpop.permute.xlu1 %2190  ;;  %v2193_v32 = vpop.permute.xlu0 %2192 }
 0x4b6   : > { %2272 = vst.msk [vmem:[%s3389_s29 + $0x70] sm:$0xff] %vm278_vm0, %v2191_v10  ;;  %2273 = vst.msk [vmem:[%s3389_s29 + $0x78] sm:$0xff] %vm278_vm0, %v2193_v32 }
 0x4b9   : > { %v2195_v30 = vpop.permute.xlu1 %2194  ;;  %v2197_v16 = vpop.permute.xlu0 %2196 }
 0x4ba   : > { %2274 = vst.msk [vmem:[%s3389_s29 + $0x80] sm:$0xff] %vm278_vm0, %v2195_v30  ;;  %2275 = vst.msk [vmem:[%s3389_s29 + $0x88] sm:$0xff] %vm278_vm0, %v2197_v16 }
 0x4bd   : > { %v2211_v42 = vpop.permute.xlu1 %2210  ;;  %v2213_v20 = vpop.permute.xlu0 %2212 }
 0x4be   : > { %2282 = vst.msk [vmem:[%s3389_s29 + $0xc0] sm:$0xff] %vm278_vm0, %v2211_v42  ;;  %2283 = vst.msk [vmem:[%s3389_s29 + $0xc8] sm:$0xff] %vm278_vm0, %v2213_v20 }
 0x4c1   : > { %v2199_v28 = vpop.permute.xlu1 %2198  ;;  %v2201_v46 = vpop.permute.xlu0 %2200 }
 0x4c2   : > { %2276 = vst.msk [vmem:[%s3389_s29 + $0x90] sm:$0xff] %vm278_vm0, %v2199_v28  ;;  %2277 = vst.msk [vmem:[%s3389_s29 + $0x98] sm:$0xff] %vm278_vm0, %v2201_v46 }
 0x4c5   : > { %v2203_v34 = vpop.permute.xlu1 %2202  ;;  %v2205_v51 = vpop.permute.xlu0 %2204 }
 0x4c6   : > { %2278 = vst.msk [vmem:[%s3389_s29 + $0xa0] sm:$0xff] %vm278_vm0, %v2203_v34  ;;  %2279 = vst.msk [vmem:[%s3389_s29 + $0xa8] sm:$0xff] %vm278_vm0, %v2205_v51 }
 0x4c9   : > { %v2215_v52 = vpop.permute.xlu1 %2214  ;;  %v2217_v35 = vpop.permute.xlu0 %2216 }
 0x4ca   : > { %2284 = vst.msk [vmem:[%s3389_s29 + $0xd0] sm:$0xff] %vm278_vm0, %v2215_v52  ;;  %2285 = vst.msk [vmem:[%s3389_s29 + $0xd8] sm:$0xff] %vm278_vm0, %v2217_v35 }
 0x4cd   : > { %v2219_v23 = vpop.permute.xlu1 %2218  ;;  %v2221_v45 = vpop.permute.xlu0 %2220 }
 0x4ce   : > { %2286 = vst.msk [vmem:[%s3389_s29 + $0xe0] sm:$0xff] %vm278_vm0, %v2219_v23  ;;  %2287 = vst.msk [vmem:[%s3389_s29 + $0xe8] sm:$0xff] %vm278_vm0, %v2221_v45 }
 0x4d1   : > { %v2207_v22 = vpop.permute.xlu1 %2206  ;;  %v2209_v13 = vpop.permute.xlu0 %2208 }
 0x4d2   : > { %2280 = vst.msk [vmem:[%s3389_s29 + $0xb0] sm:$0xff] %vm278_vm0, %v2207_v22  ;;  %2281 = vst.msk [vmem:[%s3389_s29 + $0xb8] sm:$0xff] %vm278_vm0, %v2209_v13 }
 0x4d5   : > { %v2223_v12 = vpop.permute.xlu1 %2222  ;;  %v2225_v0 = vpop.permute.xlu0 %2224 }
 0x4d6   : > { %2288 = vst.msk [vmem:[%s3389_s29 + $0xf0] sm:$0xff] %vm278_vm0, %v2223_v12  ;;  %2289 = vst.msk [vmem:[%s3389_s29 + $0xf8] sm:$0xff] %vm278_vm0, %v2225_v0 }
 0x4d7   : > { %2618 = shalt.err (!%p2615_p2)
}
 0x4d8   : > { %s2619_s11 = scalar_lea.hbm %s3456_s16, 4096  ;;  %s2623_s26 = scalar_lea.hbm %s3511_s5, 8192 }
 0x4d9   : > { %p2620_p4 = scmp.ne.s32.totalorder %s3456_s16, %s2619_s11  ;;  %p2624_p9 = scmp.lt.u32.totalorder %s3456_s16, %s3511_s5 }
 0x4da   : > { %p2625_p1 = scmp.lt.u32.totalorder %s2623_s26, %s2619_s11  ;;  %p2627_p6 = scmp.lt.u32.totalorder %s2619_s11, %s3456_s16 }
 0x4db   : > { %p2621_p5 = pnand %p2620_p4, %p3518_p11 }
 0x4dc   : > { %p2626_p3 = por %p2625_p1, %p2624_p9 }
 0x4dd   : > { %p2622_p7 = pneg %p2621_p5 }
 0x4de   : > { %p2628_p12 = por %p2627_p6, %p2626_p3 }
 0x4e0   : > { %p2629_p13 = pnand %p2628_p12, %p2622_p7 }
 0x4e2   : > { %2632 = shalt.err (!%p2629_p13)
}
 0x4e3   : > { %s2684_s25 = smov 128   ;;  %s2685_s14 = smov 8  }
 0x4e4   : > { %2484 = dma.vmem_to_hbm [thread:$0]  (%p3518_p11), %s3458_s12, 4096, %s3456_s16, %s2291_s22, %s2684_s25, %s2684_s25, %s2685_s14  }
 0x4e5 PF: > { %s2320_s15 = sand.u32 1, %s2659_s18   ;;  %p3519_p8 = scmp.ne.s32.totalorder %s3516_s6, 0 }
 0x4e6   : > { %p3520_p10 = scmp.ge.s32.totalorder %s2671_s21, 2  ;;  %s2321_s8 = scalar_lea.sflag [#allocation4], %s2320_s15 }
 0x4e8   : > { %p2491_p0 = pnand %p3520_p10, %p3519_p8 }
 0x4ea   : > { %2654 = dma.done.wait (!%p2491_p0), %s2321_s8, 4096  }
 0x4eb   : > { %2656 = vsyncadd (!%p2491_p0), %s2321_s8, 4294963200  ;;  %p18_p2 = scmp.ge.s32.totalorder %s2741_s24, 4   ;;  %s3521_s18 = smov %s2663_s19 }
 0x4ec   : > { %s3522_s19 = smov %s2667_s20  ;;  %s3523_s20 = smov %s2753_s27 }
 0x4ed   : > { %s3524_s21 = smov %s2741_s24  ;;  %20 = sbr.rel (!%p18_p2) target bundleno = 5 (0x5), region = 85 }
 0x4f4   :  { %2326 = vsyncpa [#allocation3], 1 }
 0x4f5   :  { %2328 = vsyncpa [#allocation3 + $0x1], 1 }
 0x4f6   :  { %2329 = vsyncpa [#allocation4], 1 }
 0x4f7   :  { %2331 = vsyncpa [#allocation4 + $0x1], 1 }

</bundles_post_ra>
